<compile_context>
chip_gen: v6e
topology: v6e:2x2x1
jax: 0.10.0
libtpu: 0.0.40
codegen_flags: <defaults>
</compile_context>

<pallas_src>
import math
import numpy as np
import jax
import jax.numpy as jnp
from jax.experimental import pallas as pl
from jax.experimental.pallas import tpu as pltpu

# ----- small, module-consistent hyperparameters -----------------------------
NUM_JOINTS = 4      # N
EMBED_SIZE = 8      # H
JOINT_VEC  = 9      # M (flattened 3x3 rotation per joint)
L_LAYERS   = 2      # number of AttentionLayers
NUM_HEADS  = 4
FFN        = 64     # feedforward_size
B          = 2      # batch
T          = 8      # sequence length

NM = NUM_JOINTS * JOINT_VEC     # 36 : input/output joint feature width
D  = NUM_JOINTS * EMBED_SIZE    # 32 : transformer width (embed_dim)
HD = D // NUM_HEADS             # 8  : head dim
H2 = 2 * NUM_HEADS              # 8  : spatial + temporal heads batched together
LN_EPS = 1e-5


# ----- Pallas kernel (feature-major: every activation is (features, T)) ------
def _ln_t(v, w_col, b_col):
    """LayerNorm over the feature axis (rows) of a (D, T) tile."""
    mu  = jnp.mean(v, axis=0, keepdims=True)
    var = jnp.mean(jnp.square(v - mu), axis=0, keepdims=True)
    return (v - mu) * jax.lax.rsqrt(var + LN_EPS) * w_col + b_col


def stt_kernel(x_ref, pe_ref, embw_ref, w_ref, b_ref, fin_ref, o_ref):
    # One batch element per grid step.
    xb = x_ref[0]                                                   # (NM, T)

    # Joint embedding + positional encoding (embedding bias folded into pe).
    h = jnp.dot(embw_ref[...], xb,
                preferred_element_type=jnp.float32) + pe_ref[0]     # (D, T)

    for l in range(L_LAYERS):                 # static unroll; lazy per-layer loads
        wl = w_ref[l]                         # (9D, D)  weight slab
        bl = b_ref[l]                         # (11D, 1) bias / LayerNorm slab

        # Fused spatial+temporal QKV projection (Q rows pre-scaled by 1/sqrt(HD)).
        qkv = jnp.dot(wl[0:6 * D, :], h,
                      preferred_element_type=jnp.float32) + bl[0:6 * D]   # (6D, T)
        q = qkv[0:2 * D].reshape(H2, HD, T)          # heads 0..3 spatial, 4..7 temporal
        k = qkv[2 * D:4 * D].reshape(H2, HD, T)
        v = qkv[4 * D:6 * D].reshape(H2, HD, T)

        # Head-batched attention for both sub-layers at once.
        qt = jnp.swapaxes(q, 1, 2)                                   # (H2, T, HD)
        s = jnp.einsum('htd,hds->hts', qt, k,
                       preferred_element_type=jnp.float32)           # (H2, T, T)
        s = s - jnp.max(s, axis=-1, keepdims=True)
        p = jnp.exp(s)
        p = p / jnp.sum(p, axis=-1, keepdims=True)
        o = jnp.einsum('hds,hts->hdt', v, p,
                       preferred_element_type=jnp.float32)           # (H2, HD, T)
        o = o.reshape(2 * D, T)                                      # concat heads

        sp = jnp.dot(wl[6 * D:7 * D, :], o[0:D],
                     preferred_element_type=jnp.float32) + bl[6 * D:7 * D]
        tm = jnp.dot(wl[7 * D:8 * D, :], o[D:2 * D],
                     preferred_element_type=jnp.float32) + bl[7 * D:8 * D]

        ln_w = bl[9 * D:10 * D]
        ln_b = bl[10 * D:11 * D]
        sp = _ln_t(sp + h, ln_w, ln_b)
        tm = _ln_t(tm + h, ln_w, ln_b)
        a = sp + tm

        # Collapsed feed-forward (no activation between linear1 and linear2).
        ff = jnp.dot(wl[8 * D:9 * D, :], a,
                     preferred_element_type=jnp.float32) + bl[8 * D:9 * D]
        h = _ln_t(ff + a, ln_w, ln_b)

    out = jnp.dot(fin_ref[:, 0:D], h,
                  preferred_element_type=jnp.float32) + fin_ref[:, D:D + 1]
    o_ref[0] = out + xb          # final residual; layouts already match (NM, T)


@jax.jit
def spatio_temporal_transformer(x, packed):
    pe_col, emb_w_t, w_slab, b_slab, fin_slab = packed
    return pl.pallas_call(
        stt_kernel,
        out_shape=jax.ShapeDtypeStruct((B, NM, T), jnp.float32),
        grid_spec=pltpu.PrefetchScalarGridSpec(
            num_scalar_prefetch=0,
            grid=(B,),                                             # one batch / core
            in_specs=[
                pl.BlockSpec((1, NM, T), lambda b: (b, 0, 0)),     # x
                pl.BlockSpec((1, D, 1), lambda b: (b, 0, 0)),      # pe (+ emb bias)
                pl.BlockSpec((D, NM), lambda b: (0, 0)),           # embedding W^T
                pl.BlockSpec((L_LAYERS, 9 * D, D), lambda b: (0, 0, 0)),    # layer W slab
                pl.BlockSpec((L_LAYERS, 11 * D, 1), lambda b: (0, 0, 0)),   # layer b/LN slab
                pl.BlockSpec((NM, D + 1), lambda b: (0, 0)),       # final [W^T | b]
            ],
            out_specs=pl.BlockSpec((1, NM, T), lambda b: (b, 0, 0)),
        ),
        compiler_params=pltpu.CompilerParams(
            dimension_semantics=("parallel",)),
    )(x, pe_col, emb_w_t, w_slab, b_slab, fin_slab)


# ----- deterministic raw parameters (torch conventions, weights as (in,out)) -
def init_raw_params(key):
    ks = jax.random.split(key, 8)

    def lin(k, fan_in, fan_out):
        kw, kb = jax.random.split(k)
        w = jax.random.normal(kw, (fan_in, fan_out), jnp.float32) / np.sqrt(fan_in)
        b = jax.random.normal(kb, (fan_out,), jnp.float32) * 0.02
        return w, b

    def stack(k, fi, fo):
        kk = jax.random.split(k, L_LAYERS)
        ws, bs = zip(*[lin(kk[i], fi, fo) for i in range(L_LAYERS)])
        return jnp.stack(ws), jnp.stack(bs)

    emb_w, emb_b = lin(ks[0], NM, D)            # JointEmbeddingLayer
    fin_w, fin_b = lin(ks[1], D, NM)            # final_linear_layer
    sp_in_w, sp_in_b   = stack(ks[2], D, 3 * D)  # spatial MHA in_proj   [q|k|v]
    sp_out_w, sp_out_b = stack(ks[3], D, D)      # spatial MHA out_proj
    tm_in_w, tm_in_b   = stack(ks[4], D, 3 * D)  # temporal MHA in_proj
    tm_out_w, tm_out_b = stack(ks[5], D, D)      # temporal MHA out_proj
    ff1_w, ff1_b = stack(ks[6], D, FFN)
    ff2_w, ff2_b = stack(ks[7], FFN, D)
    ln_w = jnp.ones((L_LAYERS, D), jnp.float32)  # shared LayerNorm per layer
    ln_b = jnp.zeros((L_LAYERS, D), jnp.float32)

    # Sinusoidal PE rows 0..B-1; the module adds pe[:x.size(0)] to the (B, T, D)
    # embedding (batch-indexed, faithful to the reference forward).
    position = np.arange(B, dtype=np.float32)[:, None]
    div_term = np.exp(np.arange(0, D, 2, dtype=np.float32) * (-np.log(10000.0) / D))
    pe = np.zeros((B, D), np.float32)
    pe[:, 0::2] = np.sin(position * div_term)
    pe[:, 1::2] = np.cos(position * div_term)
    pe = jnp.asarray(pe)

    return (emb_w, emb_b, pe,
            sp_in_w, sp_in_b, sp_out_w, sp_out_b,
            tm_in_w, tm_in_b, tm_out_w, tm_out_b,
            ff1_w, ff1_b, ff2_w, ff2_b, ln_w, ln_b,
            fin_w, fin_b)


# ----- host-side packing: fuse + transpose + slab layout ---------------------
def pack_params(raw):
    (emb_w, emb_b, pe,
     sp_in_w, sp_in_b, sp_out_w, sp_out_b,
     tm_in_w, tm_in_b, tm_out_w, tm_out_b,
     ff1_w, ff1_b, ff2_w, ff2_b, ln_w, ln_b,
     fin_w, fin_b) = raw
    scale = 1.0 / math.sqrt(HD)

    emb_w_t = emb_w.T                                    # (D, NM)
    pe_col  = (pe + emb_b[None, :])[:, :, None]          # (B, D, 1) emb bias folded in
    fin_slab = jnp.concatenate([fin_w.T, fin_b[:, None]], axis=1)   # (NM, D+1)

    w_rows, b_rows = [], []
    for l in range(L_LAYERS):
        spw, tmw = sp_in_w[l], tm_in_w[l]                # (D, 3D) columns [q|k|v]
        spb, tmb = sp_in_b[l], tm_in_b[l]                # (3D,)
        in_w_t = jnp.concatenate([
            spw[:, 0:D].T * scale, tmw[:, 0:D].T * scale,           # Q (pre-scaled)
            spw[:, D:2 * D].T,     tmw[:, D:2 * D].T,               # K
            spw[:, 2 * D:3 * D].T, tmw[:, 2 * D:3 * D].T], axis=0)  # V      (6D, D)
        in_b_c = jnp.concatenate([
            spb[0:D] * scale, tmb[0:D] * scale,
            spb[D:2 * D], tmb[D:2 * D], spb[2 * D:3 * D], tmb[2 * D:3 * D]])  # (6D,)
        ff_w_t = (ff1_w[l] @ ff2_w[l]).T                             # collapsed FFN (D, D)
        ff_b   = ff1_b[l] @ ff2_w[l] + ff2_b[l]                      # (D,)
        w_rows.append(jnp.concatenate(
            [in_w_t, sp_out_w[l].T, tm_out_w[l].T, ff_w_t], axis=0))  # (9D, D)
        b_rows.append(jnp.concatenate(
            [in_b_c, sp_out_b[l], tm_out_b[l], ff_b, ln_w[l], ln_b[l]])[:, None])  # (11D,1)
    return (pe_col, emb_w_t, jnp.stack(w_rows), jnp.stack(b_rows), fin_slab)


# ----- pure-JAX reference (faithful torch math on the raw, unfused params) ---
def _layer_norm_ref(v, w, b):
    mu  = jnp.mean(v, axis=-1, keepdims=True)
    var = jnp.mean(jnp.square(v - mu), axis=-1, keepdims=True)
    return (v - mu) * jax.lax.rsqrt(var + LN_EPS) * w + b


def _mha_ref(h, in_w, in_b, out_w, out_b):
    flat = h.reshape(B * T, D)
    qkv = flat @ in_w + in_b
    scale = 1.0 / math.sqrt(HD)
    acc = jnp.zeros((B * T, D), jnp.float32)
    for hh in range(NUM_HEADS):
        q = qkv[:, hh * HD:(hh + 1) * HD].reshape(B, T, HD) * scale
        k = qkv[:, D + hh * HD:D + (hh + 1) * HD].reshape(B, T, HD)
        v = qkv[:, 2 * D + hh * HD:2 * D + (hh + 1) * HD].reshape(B, T, HD)
        s = jnp.einsum('btd,bsd->bts', q, k)
        p = jax.nn.softmax(s, axis=-1)
        o = jnp.einsum('bts,bsd->btd', p, v)
        acc = acc + o.reshape(B * T, HD) @ out_w[hh * HD:(hh + 1) * HD, :]
    return (acc + out_b).reshape(B, T, D)


def _forward_reference(x, raw):
    (emb_w, emb_b, pe,
     sp_in_w, sp_in_b, sp_out_w, sp_out_b,
     tm_in_w, tm_in_b, tm_out_w, tm_out_b,
     ff1_w, ff1_b, ff2_w, ff2_b, ln_w, ln_b,
     fin_w, fin_b) = raw
    xt = jnp.transpose(x, (0, 2, 1))                                  # (B, T, NM)
    h = (xt.reshape(B * T, NM) @ emb_w + emb_b).reshape(B, T, D)
    h = h + pe[:, None, :]
    for l in range(L_LAYERS):
        sp = _mha_ref(h, sp_in_w[l], sp_in_b[l], sp_out_w[l], sp_out_b[l])
        sp = _layer_norm_ref(sp + h, ln_w[l], ln_b[l])
        tm = _mha_ref(h, tm_in_w[l], tm_in_b[l], tm_out_w[l], tm_out_b[l])
        tm = _layer_norm_ref(tm + h, ln_w[l], ln_b[l])
        a = sp + tm
        ff = a.reshape(B * T, D) @ ff1_w[l] + ff1_b[l]
        ff = ff @ ff2_w[l] + ff2_b[l]                                 # no activation
        h = _layer_norm_ref(ff.reshape(B, T, D) + a, ln_w[l], ln_b[l])
    out = (h.reshape(B * T, D) @ fin_w + fin_b).reshape(B, T, NM)
    return jnp.transpose(out, (0, 2, 1)) + x


if __name__ == "__main__":
    key = jax.random.PRNGKey(0)
    k_x, k_p = jax.random.split(key)
    # input: (B, N*M, T) flattened joint rotation matrices over time
    x = jax.random.normal(k_x, (B, NM, T), jnp.float32)
    raw = init_raw_params(k_p)
    packed = pack_params(raw)

    out = spatio_temporal_transformer(x, packed)
    out = jax.block_until_ready(out)
    assert out.shape == (B, NM, T) and out.dtype == jnp.float32

    ref = _forward_reference(x, raw)
    np.testing.assert_allclose(np.asarray(out), np.asarray(ref),
                               atol=1e-2, rtol=1e-2)
    print("KERNEL_OK")
</pallas_src>

<mosaic_0001>
module attributes {stable_mosaic.version = 11 : i64} {
  func.func @stt_kernel(%arg0: i32, %arg1: memref<1x36x8xf32, #tpu.memory_space<vmem>>, %arg2: memref<1x32x1xf32, #tpu.memory_space<vmem>>, %arg3: memref<32x36xf32, #tpu.memory_space<vmem>>, %arg4: memref<2x288x32xf32, #tpu.memory_space<vmem>>, %arg5: memref<2x352x1xf32, #tpu.memory_space<vmem>>, %arg6: memref<36x33xf32, #tpu.memory_space<vmem>>, %arg7: memref<1x36x8xf32, #tpu.memory_space<vmem>>) attributes {dimension_semantics = [#tpu.dimension_semantics<parallel>], iteration_bounds = array<i64: 2>, scalar_prefetch = 0 : i64, scratch_operands = 0 : i64, tpu.core_type = #tpu.core_type<tc>, window_params = [{transform_indices = @transform_0, window_bounds = array<i64: 1, 36, 8>}, {transform_indices = @transform_1, window_bounds = array<i64: 1, 32, 1>}, {pipeline_mode = #tpu.pipeline_mode<synchronous>, transform_indices = @transform_2, window_bounds = array<i64: 32, 36>}, {pipeline_mode = #tpu.pipeline_mode<synchronous>, transform_indices = @transform_3, window_bounds = array<i64: 2, 288, 32>}, {pipeline_mode = #tpu.pipeline_mode<synchronous>, transform_indices = @transform_4, window_bounds = array<i64: 2, 352, 1>}, {pipeline_mode = #tpu.pipeline_mode<synchronous>, transform_indices = @transform_5, window_bounds = array<i64: 36, 33>}, {transform_indices = @transform_6, window_bounds = array<i64: 1, 36, 8>}]} {
    %c0 = arith.constant 0 : index
    %c0_0 = arith.constant 0 : index
    %c0_1 = arith.constant 0 : index
    %0 = vector.load %arg1[%c0, %c0_0, %c0_1] : memref<1x36x8xf32, #tpu.memory_space<vmem>>, vector<1x36x8xf32>
    %1 = vector.shape_cast %0 : vector<1x36x8xf32> to vector<36x8xf32>
    %c0_2 = arith.constant 0 : index
    %c0_3 = arith.constant 0 : index
    %2 = vector.load %arg3[%c0_2, %c0_3] : memref<32x36xf32, #tpu.memory_space<vmem>>, vector<32x36xf32>
    %cst = arith.constant dense<0.000000e+00> : vector<32x8xf32>
    %3 = tpu.matmul %2, %1, %cst {dimension_numbers = #tpu.dot_dimension_numbers<[1], [0], [0], [1], [0, 0, 1, 1], [], []>} : vector<32x36xf32>, vector<36x8xf32>, vector<32x8xf32> -> vector<32x8xf32>
    %c0_4 = arith.constant 0 : index
    %c0_5 = arith.constant 0 : index
    %c0_6 = arith.constant 0 : index
    %4 = vector.load %arg2[%c0_4, %c0_5, %c0_6] : memref<1x32x1xf32, #tpu.memory_space<vmem>>, vector<1x32x1xf32>
    %5 = vector.shape_cast %4 : vector<1x32x1xf32> to vector<32x1xf32>
    %6 = vector.broadcast %5 : vector<32x1xf32> to vector<32x8xf32>
    %7 = arith.addf %3, %6 : vector<32x8xf32>
    %c0_7 = arith.constant 0 : index
    %c0_8 = arith.constant 0 : index
    %c0_9 = arith.constant 0 : index
    %8 = vector.load %arg4[%c0_7, %c0_8, %c0_9] : memref<2x288x32xf32, #tpu.memory_space<vmem>>, vector<1x288x32xf32>
    %9 = vector.shape_cast %8 : vector<1x288x32xf32> to vector<288x32xf32>
    %c0_10 = arith.constant 0 : index
    %c0_11 = arith.constant 0 : index
    %c0_12 = arith.constant 0 : index
    %10 = vector.load %arg5[%c0_10, %c0_11, %c0_12] : memref<2x352x1xf32, #tpu.memory_space<vmem>>, vector<1x352x1xf32>
    %11 = vector.shape_cast %10 : vector<1x352x1xf32> to vector<352x1xf32>
    %12 = vector.extract_strided_slice %9 {offsets = [0, 0], sizes = [192, 32], strides = [1, 1]} : vector<288x32xf32> to vector<192x32xf32>
    %cst_13 = arith.constant dense<0.000000e+00> : vector<192x8xf32>
    %13 = tpu.matmul %12, %7, %cst_13 {dimension_numbers = #tpu.dot_dimension_numbers<[1], [0], [0], [1], [0, 0, 1, 1], [], []>} : vector<192x32xf32>, vector<32x8xf32>, vector<192x8xf32> -> vector<192x8xf32>
    %14 = vector.extract_strided_slice %11 {offsets = [0, 0], sizes = [192, 1], strides = [1, 1]} : vector<352x1xf32> to vector<192x1xf32>
    %15 = vector.broadcast %14 : vector<192x1xf32> to vector<192x8xf32>
    %16 = arith.addf %13, %15 : vector<192x8xf32>
    %17 = vector.extract_strided_slice %16 {offsets = [0, 0], sizes = [64, 8], strides = [1, 1]} : vector<192x8xf32> to vector<64x8xf32>
    %18 = vector.shape_cast %17 : vector<64x8xf32> to vector<8x8x8xf32>
    %19 = vector.extract_strided_slice %16 {offsets = [64, 0], sizes = [64, 8], strides = [1, 1]} : vector<192x8xf32> to vector<64x8xf32>
    %20 = vector.shape_cast %19 : vector<64x8xf32> to vector<8x8x8xf32>
    %21 = vector.extract_strided_slice %16 {offsets = [128, 0], sizes = [64, 8], strides = [1, 1]} : vector<192x8xf32> to vector<64x8xf32>
    %22 = vector.shape_cast %21 : vector<64x8xf32> to vector<8x8x8xf32>
    %23 = tpu.transpose %18, [0, 2, 1] : vector<8x8x8xf32> -> vector<8x8x8xf32>
    "tpu.trace_start"() <{level = 10 : i32, message = "htd,hds->hts"}> : () -> ()
    %cst_14 = arith.constant dense<0.000000e+00> : vector<8x8x8xf32>
    %24 = tpu.matmul %23, %20, %cst_14 {dimension_numbers = #tpu.dot_dimension_numbers<[2], [1], [1], [2], [0, 0, 0, 1, 1, 2], [0], [0]>} : vector<8x8x8xf32>, vector<8x8x8xf32>, vector<8x8x8xf32> -> vector<8x8x8xf32>
    "tpu.trace_stop"() : () -> ()
    %cst_15 = arith.constant dense<0xFF800000> : vector<8x8xf32>
    %25 = vector.multi_reduction <maximumf>, %24, %cst_15 [2] : vector<8x8x8xf32> to vector<8x8xf32>
    %26 = vector.shape_cast %25 : vector<8x8xf32> to vector<8x8x1xf32>
    %27 = vector.broadcast %26 : vector<8x8x1xf32> to vector<8x8x8xf32>
    %28 = arith.subf %24, %27 : vector<8x8x8xf32>
    %29 = math.exp %28 : vector<8x8x8xf32>
    %cst_16 = arith.constant dense<0.000000e+00> : vector<8x8xf32>
    %30 = vector.multi_reduction <add>, %29, %cst_16 [2] : vector<8x8x8xf32> to vector<8x8xf32>
    %31 = vector.shape_cast %30 : vector<8x8xf32> to vector<8x8x1xf32>
    %32 = vector.broadcast %31 : vector<8x8x1xf32> to vector<8x8x8xf32>
    %33 = arith.divf %29, %32 : vector<8x8x8xf32>
    "tpu.trace_start"() <{level = 10 : i32, message = "hds,hts->hdt"}> : () -> ()
    %cst_17 = arith.constant dense<0.000000e+00> : vector<8x8x8xf32>
    %34 = tpu.matmul %22, %33, %cst_17 {dimension_numbers = #tpu.dot_dimension_numbers<[2], [2], [1], [1], [0, 0, 0, 1, 1, 1], [0], [0]>} : vector<8x8x8xf32>, vector<8x8x8xf32>, vector<8x8x8xf32> -> vector<8x8x8xf32>
    "tpu.trace_stop"() : () -> ()
    %35 = vector.shape_cast %34 : vector<8x8x8xf32> to vector<64x8xf32>
    %36 = vector.extract_strided_slice %9 {offsets = [192, 0], sizes = [32, 32], strides = [1, 1]} : vector<288x32xf32> to vector<32x32xf32>
    %37 = vector.extract_strided_slice %35 {offsets = [0, 0], sizes = [32, 8], strides = [1, 1]} : vector<64x8xf32> to vector<32x8xf32>
    %cst_18 = arith.constant dense<0.000000e+00> : vector<32x8xf32>
    %38 = tpu.matmul %36, %37, %cst_18 {dimension_numbers = #tpu.dot_dimension_numbers<[1], [0], [0], [1], [0, 0, 1, 1], [], []>} : vector<32x32xf32>, vector<32x8xf32>, vector<32x8xf32> -> vector<32x8xf32>
    %39 = vector.extract_strided_slice %11 {offsets = [192, 0], sizes = [32, 1], strides = [1, 1]} : vector<352x1xf32> to vector<32x1xf32>
    %40 = vector.broadcast %39 : vector<32x1xf32> to vector<32x8xf32>
    %41 = arith.addf %38, %40 : vector<32x8xf32>
    %42 = vector.extract_strided_slice %9 {offsets = [224, 0], sizes = [32, 32], strides = [1, 1]} : vector<288x32xf32> to vector<32x32xf32>
    %43 = vector.extract_strided_slice %35 {offsets = [32, 0], sizes = [32, 8], strides = [1, 1]} : vector<64x8xf32> to vector<32x8xf32>
    %cst_19 = arith.constant dense<0.000000e+00> : vector<32x8xf32>
    %44 = tpu.matmul %42, %43, %cst_19 {dimension_numbers = #tpu.dot_dimension_numbers<[1], [0], [0], [1], [0, 0, 1, 1], [], []>} : vector<32x32xf32>, vector<32x8xf32>, vector<32x8xf32> -> vector<32x8xf32>
    %45 = vector.extract_strided_slice %11 {offsets = [224, 0], sizes = [32, 1], strides = [1, 1]} : vector<352x1xf32> to vector<32x1xf32>
    %46 = vector.broadcast %45 : vector<32x1xf32> to vector<32x8xf32>
    %47 = arith.addf %44, %46 : vector<32x8xf32>
    %48 = vector.extract_strided_slice %11 {offsets = [288, 0], sizes = [32, 1], strides = [1, 1]} : vector<352x1xf32> to vector<32x1xf32>
    %49 = vector.extract_strided_slice %11 {offsets = [320, 0], sizes = [32, 1], strides = [1, 1]} : vector<352x1xf32> to vector<32x1xf32>
    %50 = arith.addf %41, %7 : vector<32x8xf32>
    %cst_20 = arith.constant dense<0.000000e+00> : vector<8xf32>
    %51 = vector.multi_reduction <add>, %50, %cst_20 [0] : vector<32x8xf32> to vector<8xf32>
    %52 = vector.shape_cast %51 : vector<8xf32> to vector<1x8xf32>
    %cst_21 = arith.constant 3.200000e+01 : f32
    %53 = vector.broadcast %cst_21 : f32 to vector<1x8xf32>
    %54 = arith.divf %52, %53 : vector<1x8xf32>
    %55 = vector.broadcast %54 : vector<1x8xf32> to vector<32x8xf32>
    %56 = arith.subf %50, %55 : vector<32x8xf32>
    %57 = arith.mulf %56, %56 : vector<32x8xf32>
    %cst_22 = arith.constant dense<0.000000e+00> : vector<8xf32>
    %58 = vector.multi_reduction <add>, %57, %cst_22 [0] : vector<32x8xf32> to vector<8xf32>
    %59 = vector.shape_cast %58 : vector<8xf32> to vector<1x8xf32>
    %cst_23 = arith.constant 3.200000e+01 : f32
    %60 = vector.broadcast %cst_23 : f32 to vector<1x8xf32>
    %61 = arith.divf %59, %60 : vector<1x8xf32>
    %62 = vector.broadcast %54 : vector<1x8xf32> to vector<32x8xf32>
    %63 = arith.subf %50, %62 : vector<32x8xf32>
    %cst_24 = arith.constant 9.99999974E-6 : f32
    %64 = vector.broadcast %cst_24 : f32 to vector<1x8xf32>
    %65 = arith.addf %61, %64 : vector<1x8xf32>
    %66 = math.rsqrt %65 : vector<1x8xf32>
    %67 = vector.broadcast %66 : vector<1x8xf32> to vector<32x8xf32>
    %68 = arith.mulf %63, %67 : vector<32x8xf32>
    %69 = vector.broadcast %48 : vector<32x1xf32> to vector<32x8xf32>
    %70 = arith.mulf %68, %69 : vector<32x8xf32>
    %71 = vector.broadcast %49 : vector<32x1xf32> to vector<32x8xf32>
    %72 = arith.addf %70, %71 : vector<32x8xf32>
    %73 = arith.addf %47, %7 : vector<32x8xf32>
    %cst_25 = arith.constant dense<0.000000e+00> : vector<8xf32>
    %74 = vector.multi_reduction <add>, %73, %cst_25 [0] : vector<32x8xf32> to vector<8xf32>
    %75 = vector.shape_cast %74 : vector<8xf32> to vector<1x8xf32>
    %cst_26 = arith.constant 3.200000e+01 : f32
    %76 = vector.broadcast %cst_26 : f32 to vector<1x8xf32>
    %77 = arith.divf %75, %76 : vector<1x8xf32>
    %78 = vector.broadcast %77 : vector<1x8xf32> to vector<32x8xf32>
    %79 = arith.subf %73, %78 : vector<32x8xf32>
    %80 = arith.mulf %79, %79 : vector<32x8xf32>
    %cst_27 = arith.constant dense<0.000000e+00> : vector<8xf32>
    %81 = vector.multi_reduction <add>, %80, %cst_27 [0] : vector<32x8xf32> to vector<8xf32>
    %82 = vector.shape_cast %81 : vector<8xf32> to vector<1x8xf32>
    %cst_28 = arith.constant 3.200000e+01 : f32
    %83 = vector.broadcast %cst_28 : f32 to vector<1x8xf32>
    %84 = arith.divf %82, %83 : vector<1x8xf32>
    %85 = vector.broadcast %77 : vector<1x8xf32> to vector<32x8xf32>
    %86 = arith.subf %73, %85 : vector<32x8xf32>
    %cst_29 = arith.constant 9.99999974E-6 : f32
    %87 = vector.broadcast %cst_29 : f32 to vector<1x8xf32>
    %88 = arith.addf %84, %87 : vector<1x8xf32>
    %89 = math.rsqrt %88 : vector<1x8xf32>
    %90 = vector.broadcast %89 : vector<1x8xf32> to vector<32x8xf32>
    %91 = arith.mulf %86, %90 : vector<32x8xf32>
    %92 = vector.broadcast %48 : vector<32x1xf32> to vector<32x8xf32>
    %93 = arith.mulf %91, %92 : vector<32x8xf32>
    %94 = vector.broadcast %49 : vector<32x1xf32> to vector<32x8xf32>
    %95 = arith.addf %93, %94 : vector<32x8xf32>
    %96 = arith.addf %72, %95 : vector<32x8xf32>
    %97 = vector.extract_strided_slice %9 {offsets = [256, 0], sizes = [32, 32], strides = [1, 1]} : vector<288x32xf32> to vector<32x32xf32>
    %cst_30 = arith.constant dense<0.000000e+00> : vector<32x8xf32>
    %98 = tpu.matmul %97, %96, %cst_30 {dimension_numbers = #tpu.dot_dimension_numbers<[1], [0], [0], [1], [0, 0, 1, 1], [], []>} : vector<32x32xf32>, vector<32x8xf32>, vector<32x8xf32> -> vector<32x8xf32>
    %99 = vector.extract_strided_slice %11 {offsets = [256, 0], sizes = [32, 1], strides = [1, 1]} : vector<352x1xf32> to vector<32x1xf32>
    %100 = vector.broadcast %99 : vector<32x1xf32> to vector<32x8xf32>
    %101 = arith.addf %98, %100 : vector<32x8xf32>
    %102 = arith.addf %101, %96 : vector<32x8xf32>
    %cst_31 = arith.constant dense<0.000000e+00> : vector<8xf32>
    %103 = vector.multi_reduction <add>, %102, %cst_31 [0] : vector<32x8xf32> to vector<8xf32>
    %104 = vector.shape_cast %103 : vector<8xf32> to vector<1x8xf32>
    %cst_32 = arith.constant 3.200000e+01 : f32
    %105 = vector.broadcast %cst_32 : f32 to vector<1x8xf32>
    %106 = arith.divf %104, %105 : vector<1x8xf32>
    %107 = vector.broadcast %106 : vector<1x8xf32> to vector<32x8xf32>
    %108 = arith.subf %102, %107 : vector<32x8xf32>
    %109 = arith.mulf %108, %108 : vector<32x8xf32>
    %cst_33 = arith.constant dense<0.000000e+00> : vector<8xf32>
    %110 = vector.multi_reduction <add>, %109, %cst_33 [0] : vector<32x8xf32> to vector<8xf32>
    %111 = vector.shape_cast %110 : vector<8xf32> to vector<1x8xf32>
    %cst_34 = arith.constant 3.200000e+01 : f32
    %112 = vector.broadcast %cst_34 : f32 to vector<1x8xf32>
    %113 = arith.divf %111, %112 : vector<1x8xf32>
    %114 = vector.broadcast %106 : vector<1x8xf32> to vector<32x8xf32>
    %115 = arith.subf %102, %114 : vector<32x8xf32>
    %cst_35 = arith.constant 9.99999974E-6 : f32
    %116 = vector.broadcast %cst_35 : f32 to vector<1x8xf32>
    %117 = arith.addf %113, %116 : vector<1x8xf32>
    %118 = math.rsqrt %117 : vector<1x8xf32>
    %119 = vector.broadcast %118 : vector<1x8xf32> to vector<32x8xf32>
    %120 = arith.mulf %115, %119 : vector<32x8xf32>
    %121 = vector.broadcast %48 : vector<32x1xf32> to vector<32x8xf32>
    %122 = arith.mulf %120, %121 : vector<32x8xf32>
    %123 = vector.broadcast %49 : vector<32x1xf32> to vector<32x8xf32>
    %124 = arith.addf %122, %123 : vector<32x8xf32>
    %c1 = arith.constant 1 : index
    %c0_36 = arith.constant 0 : index
    %c0_37 = arith.constant 0 : index
    %125 = vector.load %arg4[%c1, %c0_36, %c0_37] : memref<2x288x32xf32, #tpu.memory_space<vmem>>, vector<1x288x32xf32>
    %126 = vector.shape_cast %125 : vector<1x288x32xf32> to vector<288x32xf32>
    %c1_38 = arith.constant 1 : index
    %c0_39 = arith.constant 0 : index
    %c0_40 = arith.constant 0 : index
    %127 = vector.load %arg5[%c1_38, %c0_39, %c0_40] : memref<2x352x1xf32, #tpu.memory_space<vmem>>, vector<1x352x1xf32>
    %128 = vector.shape_cast %127 : vector<1x352x1xf32> to vector<352x1xf32>
    %129 = vector.extract_strided_slice %126 {offsets = [0, 0], sizes = [192, 32], strides = [1, 1]} : vector<288x32xf32> to vector<192x32xf32>
    %cst_41 = arith.constant dense<0.000000e+00> : vector<192x8xf32>
    %130 = tpu.matmul %129, %124, %cst_41 {dimension_numbers = #tpu.dot_dimension_numbers<[1], [0], [0], [1], [0, 0, 1, 1], [], []>} : vector<192x32xf32>, vector<32x8xf32>, vector<192x8xf32> -> vector<192x8xf32>
    %131 = vector.extract_strided_slice %128 {offsets = [0, 0], sizes = [192, 1], strides = [1, 1]} : vector<352x1xf32> to vector<192x1xf32>
    %132 = vector.broadcast %131 : vector<192x1xf32> to vector<192x8xf32>
    %133 = arith.addf %130, %132 : vector<192x8xf32>
    %134 = vector.extract_strided_slice %133 {offsets = [0, 0], sizes = [64, 8], strides = [1, 1]} : vector<192x8xf32> to vector<64x8xf32>
    %135 = vector.shape_cast %134 : vector<64x8xf32> to vector<8x8x8xf32>
    %136 = vector.extract_strided_slice %133 {offsets = [64, 0], sizes = [64, 8], strides = [1, 1]} : vector<192x8xf32> to vector<64x8xf32>
    %137 = vector.shape_cast %136 : vector<64x8xf32> to vector<8x8x8xf32>
    %138 = vector.extract_strided_slice %133 {offsets = [128, 0], sizes = [64, 8], strides = [1, 1]} : vector<192x8xf32> to vector<64x8xf32>
    %139 = vector.shape_cast %138 : vector<64x8xf32> to vector<8x8x8xf32>
    %140 = tpu.transpose %135, [0, 2, 1] : vector<8x8x8xf32> -> vector<8x8x8xf32>
    "tpu.trace_start"() <{level = 10 : i32, message = "htd,hds->hts"}> : () -> ()
    %cst_42 = arith.constant dense<0.000000e+00> : vector<8x8x8xf32>
    %141 = tpu.matmul %140, %137, %cst_42 {dimension_numbers = #tpu.dot_dimension_numbers<[2], [1], [1], [2], [0, 0, 0, 1, 1, 2], [0], [0]>} : vector<8x8x8xf32>, vector<8x8x8xf32>, vector<8x8x8xf32> -> vector<8x8x8xf32>
    "tpu.trace_stop"() : () -> ()
    %cst_43 = arith.constant dense<0xFF800000> : vector<8x8xf32>
    %142 = vector.multi_reduction <maximumf>, %141, %cst_43 [2] : vector<8x8x8xf32> to vector<8x8xf32>
    %143 = vector.shape_cast %142 : vector<8x8xf32> to vector<8x8x1xf32>
    %144 = vector.broadcast %143 : vector<8x8x1xf32> to vector<8x8x8xf32>
    %145 = arith.subf %141, %144 : vector<8x8x8xf32>
    %146 = math.exp %145 : vector<8x8x8xf32>
    %cst_44 = arith.constant dense<0.000000e+00> : vector<8x8xf32>
    %147 = vector.multi_reduction <add>, %146, %cst_44 [2] : vector<8x8x8xf32> to vector<8x8xf32>
    %148 = vector.shape_cast %147 : vector<8x8xf32> to vector<8x8x1xf32>
    %149 = vector.broadcast %148 : vector<8x8x1xf32> to vector<8x8x8xf32>
    %150 = arith.divf %146, %149 : vector<8x8x8xf32>
    "tpu.trace_start"() <{level = 10 : i32, message = "hds,hts->hdt"}> : () -> ()
    %cst_45 = arith.constant dense<0.000000e+00> : vector<8x8x8xf32>
    %151 = tpu.matmul %139, %150, %cst_45 {dimension_numbers = #tpu.dot_dimension_numbers<[2], [2], [1], [1], [0, 0, 0, 1, 1, 1], [0], [0]>} : vector<8x8x8xf32>, vector<8x8x8xf32>, vector<8x8x8xf32> -> vector<8x8x8xf32>
    "tpu.trace_stop"() : () -> ()
    %152 = vector.shape_cast %151 : vector<8x8x8xf32> to vector<64x8xf32>
    %153 = vector.extract_strided_slice %126 {offsets = [192, 0], sizes = [32, 32], strides = [1, 1]} : vector<288x32xf32> to vector<32x32xf32>
    %154 = vector.extract_strided_slice %152 {offsets = [0, 0], sizes = [32, 8], strides = [1, 1]} : vector<64x8xf32> to vector<32x8xf32>
    %cst_46 = arith.constant dense<0.000000e+00> : vector<32x8xf32>
    %155 = tpu.matmul %153, %154, %cst_46 {dimension_numbers = #tpu.dot_dimension_numbers<[1], [0], [0], [1], [0, 0, 1, 1], [], []>} : vector<32x32xf32>, vector<32x8xf32>, vector<32x8xf32> -> vector<32x8xf32>
    %156 = vector.extract_strided_slice %128 {offsets = [192, 0], sizes = [32, 1], strides = [1, 1]} : vector<352x1xf32> to vector<32x1xf32>
    %157 = vector.broadcast %156 : vector<32x1xf32> to vector<32x8xf32>
    %158 = arith.addf %155, %157 : vector<32x8xf32>
    %159 = vector.extract_strided_slice %126 {offsets = [224, 0], sizes = [32, 32], strides = [1, 1]} : vector<288x32xf32> to vector<32x32xf32>
    %160 = vector.extract_strided_slice %152 {offsets = [32, 0], sizes = [32, 8], strides = [1, 1]} : vector<64x8xf32> to vector<32x8xf32>
    %cst_47 = arith.constant dense<0.000000e+00> : vector<32x8xf32>
    %161 = tpu.matmul %159, %160, %cst_47 {dimension_numbers = #tpu.dot_dimension_numbers<[1], [0], [0], [1], [0, 0, 1, 1], [], []>} : vector<32x32xf32>, vector<32x8xf32>, vector<32x8xf32> -> vector<32x8xf32>
    %162 = vector.extract_strided_slice %128 {offsets = [224, 0], sizes = [32, 1], strides = [1, 1]} : vector<352x1xf32> to vector<32x1xf32>
    %163 = vector.broadcast %162 : vector<32x1xf32> to vector<32x8xf32>
    %164 = arith.addf %161, %163 : vector<32x8xf32>
    %165 = vector.extract_strided_slice %128 {offsets = [288, 0], sizes = [32, 1], strides = [1, 1]} : vector<352x1xf32> to vector<32x1xf32>
    %166 = vector.extract_strided_slice %128 {offsets = [320, 0], sizes = [32, 1], strides = [1, 1]} : vector<352x1xf32> to vector<32x1xf32>
    %167 = arith.addf %158, %124 : vector<32x8xf32>
    %cst_48 = arith.constant dense<0.000000e+00> : vector<8xf32>
    %168 = vector.multi_reduction <add>, %167, %cst_48 [0] : vector<32x8xf32> to vector<8xf32>
    %169 = vector.shape_cast %168 : vector<8xf32> to vector<1x8xf32>
    %cst_49 = arith.constant 3.200000e+01 : f32
    %170 = vector.broadcast %cst_49 : f32 to vector<1x8xf32>
    %171 = arith.divf %169, %170 : vector<1x8xf32>
    %172 = vector.broadcast %171 : vector<1x8xf32> to vector<32x8xf32>
    %173 = arith.subf %167, %172 : vector<32x8xf32>
    %174 = arith.mulf %173, %173 : vector<32x8xf32>
    %cst_50 = arith.constant dense<0.000000e+00> : vector<8xf32>
    %175 = vector.multi_reduction <add>, %174, %cst_50 [0] : vector<32x8xf32> to vector<8xf32>
    %176 = vector.shape_cast %175 : vector<8xf32> to vector<1x8xf32>
    %cst_51 = arith.constant 3.200000e+01 : f32
    %177 = vector.broadcast %cst_51 : f32 to vector<1x8xf32>
    %178 = arith.divf %176, %177 : vector<1x8xf32>
    %179 = vector.broadcast %171 : vector<1x8xf32> to vector<32x8xf32>
    %180 = arith.subf %167, %179 : vector<32x8xf32>
    %cst_52 = arith.constant 9.99999974E-6 : f32
    %181 = vector.broadcast %cst_52 : f32 to vector<1x8xf32>
    %182 = arith.addf %178, %181 : vector<1x8xf32>
    %183 = math.rsqrt %182 : vector<1x8xf32>
    %184 = vector.broadcast %183 : vector<1x8xf32> to vector<32x8xf32>
    %185 = arith.mulf %180, %184 : vector<32x8xf32>
    %186 = vector.broadcast %165 : vector<32x1xf32> to vector<32x8xf32>
    %187 = arith.mulf %185, %186 : vector<32x8xf32>
    %188 = vector.broadcast %166 : vector<32x1xf32> to vector<32x8xf32>
    %189 = arith.addf %187, %188 : vector<32x8xf32>
    %190 = arith.addf %164, %124 : vector<32x8xf32>
    %cst_53 = arith.constant dense<0.000000e+00> : vector<8xf32>
    %191 = vector.multi_reduction <add>, %190, %cst_53 [0] : vector<32x8xf32> to vector<8xf32>
    %192 = vector.shape_cast %191 : vector<8xf32> to vector<1x8xf32>
    %cst_54 = arith.constant 3.200000e+01 : f32
    %193 = vector.broadcast %cst_54 : f32 to vector<1x8xf32>
    %194 = arith.divf %192, %193 : vector<1x8xf32>
    %195 = vector.broadcast %194 : vector<1x8xf32> to vector<32x8xf32>
    %196 = arith.subf %190, %195 : vector<32x8xf32>
    %197 = arith.mulf %196, %196 : vector<32x8xf32>
    %cst_55 = arith.constant dense<0.000000e+00> : vector<8xf32>
    %198 = vector.multi_reduction <add>, %197, %cst_55 [0] : vector<32x8xf32> to vector<8xf32>
    %199 = vector.shape_cast %198 : vector<8xf32> to vector<1x8xf32>
    %cst_56 = arith.constant 3.200000e+01 : f32
    %200 = vector.broadcast %cst_56 : f32 to vector<1x8xf32>
    %201 = arith.divf %199, %200 : vector<1x8xf32>
    %202 = vector.broadcast %194 : vector<1x8xf32> to vector<32x8xf32>
    %203 = arith.subf %190, %202 : vector<32x8xf32>
    %cst_57 = arith.constant 9.99999974E-6 : f32
    %204 = vector.broadcast %cst_57 : f32 to vector<1x8xf32>
    %205 = arith.addf %201, %204 : vector<1x8xf32>
    %206 = math.rsqrt %205 : vector<1x8xf32>
    %207 = vector.broadcast %206 : vector<1x8xf32> to vector<32x8xf32>
    %208 = arith.mulf %203, %207 : vector<32x8xf32>
    %209 = vector.broadcast %165 : vector<32x1xf32> to vector<32x8xf32>
    %210 = arith.mulf %208, %209 : vector<32x8xf32>
    %211 = vector.broadcast %166 : vector<32x1xf32> to vector<32x8xf32>
    %212 = arith.addf %210, %211 : vector<32x8xf32>
    %213 = arith.addf %189, %212 : vector<32x8xf32>
    %214 = vector.extract_strided_slice %126 {offsets = [256, 0], sizes = [32, 32], strides = [1, 1]} : vector<288x32xf32> to vector<32x32xf32>
    %cst_58 = arith.constant dense<0.000000e+00> : vector<32x8xf32>
    %215 = tpu.matmul %214, %213, %cst_58 {dimension_numbers = #tpu.dot_dimension_numbers<[1], [0], [0], [1], [0, 0, 1, 1], [], []>} : vector<32x32xf32>, vector<32x8xf32>, vector<32x8xf32> -> vector<32x8xf32>
    %216 = vector.extract_strided_slice %128 {offsets = [256, 0], sizes = [32, 1], strides = [1, 1]} : vector<352x1xf32> to vector<32x1xf32>
    %217 = vector.broadcast %216 : vector<32x1xf32> to vector<32x8xf32>
    %218 = arith.addf %215, %217 : vector<32x8xf32>
    %219 = arith.addf %218, %213 : vector<32x8xf32>
    %cst_59 = arith.constant dense<0.000000e+00> : vector<8xf32>
    %220 = vector.multi_reduction <add>, %219, %cst_59 [0] : vector<32x8xf32> to vector<8xf32>
    %221 = vector.shape_cast %220 : vector<8xf32> to vector<1x8xf32>
    %cst_60 = arith.constant 3.200000e+01 : f32
    %222 = vector.broadcast %cst_60 : f32 to vector<1x8xf32>
    %223 = arith.divf %221, %222 : vector<1x8xf32>
    %224 = vector.broadcast %223 : vector<1x8xf32> to vector<32x8xf32>
    %225 = arith.subf %219, %224 : vector<32x8xf32>
    %226 = arith.mulf %225, %225 : vector<32x8xf32>
    %cst_61 = arith.constant dense<0.000000e+00> : vector<8xf32>
    %227 = vector.multi_reduction <add>, %226, %cst_61 [0] : vector<32x8xf32> to vector<8xf32>
    %228 = vector.shape_cast %227 : vector<8xf32> to vector<1x8xf32>
    %cst_62 = arith.constant 3.200000e+01 : f32
    %229 = vector.broadcast %cst_62 : f32 to vector<1x8xf32>
    %230 = arith.divf %228, %229 : vector<1x8xf32>
    %231 = vector.broadcast %223 : vector<1x8xf32> to vector<32x8xf32>
    %232 = arith.subf %219, %231 : vector<32x8xf32>
    %cst_63 = arith.constant 9.99999974E-6 : f32
    %233 = vector.broadcast %cst_63 : f32 to vector<1x8xf32>
    %234 = arith.addf %230, %233 : vector<1x8xf32>
    %235 = math.rsqrt %234 : vector<1x8xf32>
    %236 = vector.broadcast %235 : vector<1x8xf32> to vector<32x8xf32>
    %237 = arith.mulf %232, %236 : vector<32x8xf32>
    %238 = vector.broadcast %165 : vector<32x1xf32> to vector<32x8xf32>
    %239 = arith.mulf %237, %238 : vector<32x8xf32>
    %240 = vector.broadcast %166 : vector<32x1xf32> to vector<32x8xf32>
    %241 = arith.addf %239, %240 : vector<32x8xf32>
    %c0_64 = arith.constant 0 : index
    %c0_65 = arith.constant 0 : index
    %242 = vector.load %arg6[%c0_64, %c0_65] : memref<36x33xf32, #tpu.memory_space<vmem>>, vector<36x32xf32>
    %cst_66 = arith.constant dense<0.000000e+00> : vector<36x8xf32>
    %243 = tpu.matmul %242, %241, %cst_66 {dimension_numbers = #tpu.dot_dimension_numbers<[1], [0], [0], [1], [0, 0, 1, 1], [], []>} : vector<36x32xf32>, vector<32x8xf32>, vector<36x8xf32> -> vector<36x8xf32>
    %c0_67 = arith.constant 0 : index
    %c32 = arith.constant 32 : index
    %244 = vector.load %arg6[%c0_67, %c32] : memref<36x33xf32, #tpu.memory_space<vmem>>, vector<36x1xf32>
    %245 = vector.broadcast %244 : vector<36x1xf32> to vector<36x8xf32>
    %246 = arith.addf %243, %245 : vector<36x8xf32>
    %247 = arith.addf %246, %1 : vector<36x8xf32>
    %c0_68 = arith.constant 0 : index
    %c0_69 = arith.constant 0 : index
    %c0_70 = arith.constant 0 : index
    %248 = vector.load %arg7[%c0_68, %c0_69, %c0_70] : memref<1x36x8xf32, #tpu.memory_space<vmem>>, vector<1x36x8xf32>
    %249 = vector.shape_cast %248 : vector<1x36x8xf32> to vector<36x8xf32>
    %250 = vector.shape_cast %247 : vector<36x8xf32> to vector<1x36x8xf32>
    tpu.vector_store %arg7[%c0_68, %c0_69, %c0_70], %250 {strides = array<i32>} : memref<1x36x8xf32, #tpu.memory_space<vmem>>, vector<1x36x8xf32>,
    return
  }
  func.func @transform_0(%arg0: i32) -> (i32, i32, i32) {
    %c0_i32 = arith.constant 0 : i32
    %c0_i32_0 = arith.constant 0 : i32
    %c0_i32_1 = arith.constant 0 : i32
    return %arg0, %c0_i32, %c0_i32_0 : i32, i32, i32
  }
  func.func @transform_1(%arg0: i32) -> (i32, i32, i32) {
    %c0_i32 = arith.constant 0 : i32
    %c0_i32_0 = arith.constant 0 : i32
    %c0_i32_1 = arith.constant 0 : i32
    return %arg0, %c0_i32, %c0_i32_0 : i32, i32, i32
  }
  func.func @transform_2(%arg0: i32) -> (i32, i32) {
    %c0_i32 = arith.constant 0 : i32
    %c0_i32_0 = arith.constant 0 : i32
    %c0_i32_1 = arith.constant 0 : i32
    return %c0_i32, %c0_i32_0 : i32, i32
  }
  func.func @transform_3(%arg0: i32) -> (i32, i32, i32) {
    %c0_i32 = arith.constant 0 : i32
    %c0_i32_0 = arith.constant 0 : i32
    %c0_i32_1 = arith.constant 0 : i32
    %c0_i32_2 = arith.constant 0 : i32
    return %c0_i32, %c0_i32_0, %c0_i32_1 : i32, i32, i32
  }
  func.func @transform_4(%arg0: i32) -> (i32, i32, i32) {
    %c0_i32 = arith.constant 0 : i32
    %c0_i32_0 = arith.constant 0 : i32
    %c0_i32_1 = arith.constant 0 : i32
    %c0_i32_2 = arith.constant 0 : i32
    return %c0_i32, %c0_i32_0, %c0_i32_1 : i32, i32, i32
  }
  func.func @transform_5(%arg0: i32) -> (i32, i32) {
    %c0_i32 = arith.constant 0 : i32
    %c0_i32_0 = arith.constant 0 : i32
    %c0_i32_1 = arith.constant 0 : i32
    return %c0_i32, %c0_i32_0 : i32, i32
  }
  func.func @transform_6(%arg0: i32) -> (i32, i32, i32) {
    %c0_i32 = arith.constant 0 : i32
    %c0_i32_0 = arith.constant 0 : i32
    %c0_i32_1 = arith.constant 0 : i32
    return %arg0, %c0_i32, %c0_i32_0 : i32, i32, i32
  }
}

</mosaic_0001>

<bundles_post_ra>
// kernel: spatio_temporal_transformer.1
= control target key start
LH: loop header
LB: loop body
LE: loop exit
PB: predicated region body
PF: predicated region fallthrough
CT: control target
= control target key end

     0   :  { %s6644_s21 = smov 0   ;;  %s7759_s0 = inlined_call_operand.vmem [shape: f32[2,36,8], index: 0, kind: input, shape index: {}]   ;;  %s7760_s1 = inlined_call_operand.vmem [shape: f32[2,32,1], index: 1, kind: input, shape index: {}]   ;;  %s7761_s2 = inlined_call_operand.vmem [shape: f32[32,36], index: 2, kind: input, shape index: {}]   ;;  %s7762_s3 = inlined_call_operand.vmem [shape: f32[2,288,32], index: 3, kind: input, shape index: {}]   ;;  %s7763_s4 = inlined_call_operand.vmem [shape: f32[2,352,1], index: 4, kind: input, shape index: {}]   ;;  %s7764_s5 = inlined_call_operand.vmem [shape: f32[36,33], index: 5, kind: input, shape index: {}]   ;;  %s7765_s6 = inlined_call_operand.vmem [shape: f32[2,36,8], index: 6, kind: output, shape index: {}]  }
   0x1 LB: > { %s5720_s22 = sadd.s32 4294967295, %s6603_s21   ;;  %p5724_p0 = scmp.ge.s32.totalorder %s6603_s21, 1  ;;  %s6603_s21 = sphi %s6644_s21, %s16_s21  }
   0x2   : > { %p222_p1 = scmp.lt.s32.totalorder %s6603_s21, 3 }
   0x4   : > { %p223_p2 = pnand %p5724_p0, %p222_p1 }
   0x5   : > { %p257_p3 = scmp.lt.s32.totalorder (!%p223_p2), %s5720_s22, 1 }
   0x6   : > { %226 = sbr.rel (%p223_p2) target bundleno = 3678 (0xe5e), region = 44 }
   0xb   : > { %v277_v0 = vld [vmem:[%s7761_s2] sm:$0xff]  ;;  %vm305_vm0 = vcmask 293888   ;;  %s7767_s22 = smov (!%p257_p3, %s5720_s22), 1  ;;  %v6605_v1 = vmov 0   ;;  %vm318_vm1 = vcmask 1043456   ;;  %v444_v12 = vld [vmem:[%s7763_s4 + $0x8] sm:$0xff] }
   0xc   : > { %6138 = vmatprep.mubr.msk.f32.mxu0 %vm305_vm0, %v277_v0  ;;  %6512 = vset.pattern.permute.xlu0 %v6605_v1  ;;  %s6499_s25 = smul.u32 40, %s7767_s22  ;;  %s5941_s26 = sshll.u32 %s7767_s22, 5  ;;  %v443_v10 = vld [vmem:[%s7763_s4] sm:$0xff]  ;;  %v278_v13 = vld [vmem:[%s7761_s2 + $0x8] sm:$0xff]  ;;  %v279_v14 = vld [vmem:[%s7761_s2 + $0x10] sm:$0xff]  ;;  %vm607_vm2 = vcmask 261120  }
   0xd   : > { %6513 = vset.pattern.permute.xlu1 %v6605_v1  ;;  %s266_s29 = scalar_lea.vmem %s7760_s1, %s5941_s26  ;;  %v445_v15 = vld [vmem:[%s7763_s4 + $0x10] sm:$0xff]  ;;  %v446_v16 = vld [vmem:[%s7763_s4 + $0x18] sm:$0xff]  ;;  %v447_v18 = vld [vmem:[%s7763_s4 + $0x20] sm:$0xff]  ;;  %v6606_v58 = vmov 0.0   ;;  %vm6607_vm3 = vmmov 0   ;;  %vm1121_vm4 = vcmask 64512  }
   0xe   : > { %s6668_s8 = scalar_lea.vmem %s7759_s0, %s6499_s25  ;;  %v284_v2 = vld [vmem:[%s266_s29 + $0x18] sm:$0xff]  ;;  %v282_v3 = vld [vmem:[%s266_s29 + $0x8] sm:$0xff]  ;;  %v283_v6 = vld [vmem:[%s266_s29 + $0x10] sm:$0xff]  ;;  %s7740_s30 = scalar_lea.vmem %s7765_s6, %s6499_s25  ;;  %vm5651_vm5 = vcmask 60416  }
   0xf   : > { %v276_v4 = vld [vmem:[%s6668_s8 + $0x20] sm:$0xf]  ;;  %v275_v5 = vld [vmem:[%s6668_s8 + $0x18] sm:$0xff]  ;;  %302 = vperm.xlu0 %6512, %v284_v2   ;;  %292 = vperm.xlu1 %6513, %v282_v3   ;;  %v274_v7 = vld [vmem:[%s6668_s8 + $0x10] sm:$0xff] }
  0x10   : > { %6128 = vmatprep.subr.msk.mxu0 %vm318_vm1, %v276_v4  ;;  %v281_v8 = vld [vmem:[%s266_s29] sm:$0xff]  ;;  %v273_v9 = vld [vmem:[%s6668_s8 + $0x8] sm:$0xff]  ;;  %v280_v17 = vld [vmem:[%s7761_s2 + $0x18] sm:$0xff] }
  0x11   : > { %6129 = vmatpush3.msk.msra.mxu0 %vm318_vm1, %v276_v4  ;;  %v272_v11 = vld [vmem:[%s6668_s8] sm:$0xff]  ;;  %v448_v19 = vld [vmem:[%s7763_s4 + $0x28] sm:$0xff]  ;;  %v449_v20 = vld [vmem:[%s7763_s4 + $0x30] sm:$0xff] }
  0x12   : > { %6130 = vmatprep.subr.mxu0 %v275_v5  ;;  %v450_v21 = vld [vmem:[%s7763_s4 + $0x38] sm:$0xff]  ;;  %v451_v22 = vld [vmem:[%s7763_s4 + $0x40] sm:$0xff]  ;;  %v452_v23 = vld [vmem:[%s7763_s4 + $0x48] sm:$0xff] }
  0x13   : > { %6131 = vmatpush3.msra.mxu0 %v275_v5  ;;  %297 = vperm.xlu0 %6512, %v283_v6   ;;  %v453_v24 = vld [vmem:[%s7763_s4 + $0x50] sm:$0xff]  ;;  %v454_v25 = vld [vmem:[%s7763_s4 + $0x58] sm:$0xff]  ;;  %v455_v26 = vld [vmem:[%s7763_s4 + $0x60] sm:$0xff] }
  0x14   : > { %6132 = vmatprep.subr.mxu0 %v274_v7  ;;  %287 = vperm.xlu1 %6513, %v281_v8   ;;  %v456_v27 = vld [vmem:[%s7763_s4 + $0x68] sm:$0xff]  ;;  %v457_v28 = vld [vmem:[%s7763_s4 + $0x70] sm:$0xff]  ;;  %v458_v29 = vld [vmem:[%s7763_s4 + $0x78] sm:$0xff] }
  0x15   : > { %6133 = vmatpush3.msra.mxu0 %v274_v7  ;;  %v407_v30 = vld [vmem:[%s7762_s3] sm:$0xff]  ;;  %v408_v43 = vld [vmem:[%s7762_s3 + $0x8] sm:$0xff]  ;;  %v409_v44 = vld [vmem:[%s7762_s3 + $0x10] sm:$0xff] }
  0x16   : > { %6134 = vmatprep.subr.mxu0 %v273_v9  ;;  %6152 = vmatprep.mubr.msk.f32.mxu1 %vm607_vm2, %v407_v30  ;;  %v410_v45 = vld [vmem:[%s7762_s3 + $0x18] sm:$0xff]  ;;  %v411_v46 = vld [vmem:[%s7762_s3 + $0x20] sm:$0xff]  ;;  %v412_v47 = vld [vmem:[%s7762_s3 + $0x28] sm:$0xff] }
  0x17   : > { %6135 = vmatpush3.msra.mxu0 %v273_v9  ;;  %489 = vperm.xlu0 %6512, %v443_v10   ;;  %v413_v48 = vld [vmem:[%s7762_s3 + $0x30] sm:$0xff]  ;;  %v414_v49 = vld [vmem:[%s7762_s3 + $0x38] sm:$0xff]  ;;  %v415_v50 = vld [vmem:[%s7762_s3 + $0x40] sm:$0xff] }
  0x18   : > { %6136 = vmatprep.subr.mxu0 %v272_v11  ;;  %494 = vperm.xlu1 %6513, %v444_v12   ;;  %v416_v51 = vld [vmem:[%s7762_s3 + $0x48] sm:$0xff]  ;;  %v417_v52 = vld [vmem:[%s7762_s3 + $0x50] sm:$0xff]  ;;  %v418_v53 = vld [vmem:[%s7762_s3 + $0x58] sm:$0xff] }
  0x19   : > { %6137 = vmatpush3.msra.mxu0 %v272_v11  ;;  %v419_v54 = vld [vmem:[%s7762_s3 + $0x60] sm:$0xff]  ;;  %v420_v55 = vld [vmem:[%s7762_s3 + $0x68] sm:$0xff]  ;;  %v421_v56 = vld [vmem:[%s7762_s3 + $0x70] sm:$0xff] }
  0x1a   : > { %6139 = vmatmul.mubr.msk.f32.vlgmr.msra.gmra.mxu0 %vm305_vm0, %v278_v13  ;;  %v422_v57 = vld [vmem:[%s7762_s3 + $0x78] sm:$0xff]  ;;  %6188 = vmatprep.subr.mxu0 %v6606_v58 }
  0x1b   : > { %6141 = vmatprep.mubr.msk.f32.mxu0 %vm305_vm0, %v279_v14  ;;  %499 = vperm.xlu0 %6512, %v445_v15  }
  0x1c   : > { %504 = vperm.xlu1 %6513, %v446_v16  }
  0x1e   : > { %6142 = vmatmul.mubr.msk.f32.gmra.mxu0 %vm305_vm0, %v280_v17 }
  0x1f   : > { %509 = vperm.xlu0 %6512, %v447_v18   ;;  %6190 = vmatprep.mubr.msk.f32.mxu0 %vm6607_vm3, %v6606_v58 }
  0x20   : > { %514 = vperm.xlu1 %6513, %v448_v19  }
  0x23   : > { %519 = vperm.xlu0 %6512, %v449_v20  }
  0x24   : > { %524 = vperm.xlu1 %6513, %v450_v21  }
  0x27   : > { %529 = vperm.xlu0 %6512, %v451_v22  }
  0x28   : > { %534 = vperm.xlu1 %6513, %v452_v23   ;;  %v423_v23 = vld [vmem:[%s7762_s3 + $0x80] sm:$0xff] }
  0x2b   : > { %539 = vperm.xlu0 %6512, %v453_v24   ;;  %v424_v24 = vld [vmem:[%s7762_s3 + $0x88] sm:$0xff] }
  0x2c   : > { %544 = vperm.xlu1 %6513, %v454_v25   ;;  %v425_v25 = vld [vmem:[%s7762_s3 + $0x90] sm:$0xff] }
  0x2f   : > { %549 = vperm.xlu0 %6512, %v455_v26   ;;  %v426_v26 = vld [vmem:[%s7762_s3 + $0x98] sm:$0xff] }
  0x30   : > { %554 = vperm.xlu1 %6513, %v456_v27   ;;  %v427_v27 = vld [vmem:[%s7762_s3 + $0xa0] sm:$0xff] }
  0x33   : > { %559 = vperm.xlu0 %6512, %v457_v28   ;;  %v428_v28 = vld [vmem:[%s7762_s3 + $0xa8] sm:$0xff] }
  0x34   : > { %564 = vperm.xlu1 %6513, %v458_v29  }
  0x8a   : > { %v303_v31 = vpop.permute.xlu0 %302  ;;  %v293_v34 = vpop.permute.xlu1 %292 }
  0x8e   : > { %v298_v37 = vpop.permute.xlu0 %297 }
  0x8f   : > { %v288_v41 = vpop.permute.xlu1 %287 }
  0x92   : > { %v490_v59 = vpop.permute.xlu0 %489 }
  0x93   : > { %v495_v60 = vpop.permute.xlu1 %494 }
  0x96   : > { %v500_v61 = vpop.permute.xlu0 %499 }
  0x97   : > { %v505_v62 = vpop.permute.xlu1 %504 }
  0x9a   : > { %v510_v4 = vpop.permute.xlu0 %509 }
  0x9b   : > { %v515_v5 = vpop.permute.xlu1 %514 }
  0x9e   : > { %v520_v11 = vpop.permute.xlu0 %519 }
  0x9f   : > { %v525_v13 = vpop.permute.xlu1 %524 }
  0xa2   : > { %v530_v19 = vpop.permute.xlu0 %529 }
  0xa3   : > { %v535_v29 = vpop.permute.xlu1 %534 }
  0xa6   : > { %v540_v30 = vpop.permute.xlu0 %539 }
  0xda   : > { %v6140_v32 = vpop.f32.mrf.mxu0 }
  0xdb   : > { %v6745_v40 = vadd.f32 %v6140_v32, %v293_v34  ;;  %v550_v32 = vpop.permute.xlu0 %549 }
  0xdc   : > { %v388_v33 = vpop.f32.mrf.mxu0 }
  0xdd   : > { %v6749_v42 = vadd.f32 %v388_v33, %v288_v41 }
  0xde   : > { %v6143_v35 = vpop.f32.mrf.mxu0 }
  0xdf   : > { %v6739_v36 = vadd.f32 %v6143_v35, %v303_v31  ;;  %v545_v31 = vpop.permute.xlu1 %544  ;;  %v560_v34 = vpop.permute.xlu0 %559 }
  0xe0   : > { %v398_v38 = vpop.f32.mrf.mxu0 }
  0xe1   : > { %v6741_v39 = vadd.f32 %v398_v38, %v298_v37  ;;  %6144 = vmatprep.subr.mxu1 %v6739_v36 }
  0xe2   : > { %6145 = vmatpush3.msra.mxu1 %v6739_v36 }
  0xe3   : > { %6146 = vmatprep.subr.mxu1 %v6741_v39  ;;  %v555_v33 = vpop.permute.xlu1 %554 }
  0xe4   : > { %6147 = vmatpush3.msra.mxu1 %v6741_v39 }
  0xe5   : > { %6148 = vmatprep.subr.mxu1 %v6745_v40 }
  0xe6   : > { %6149 = vmatpush3.msra.mxu1 %v6745_v40 }
  0xe7   : > { %6150 = vmatprep.subr.mxu1 %v6749_v42  ;;  %v565_v37 = vpop.permute.xlu1 %564 }
  0xe8   : > { %6151 = vmatpush3.msra.mxu1 %v6749_v42 }
  0xe9   : > { %6153 = vmatmul.mubr.msk.f32.vlgmr.msra.gmra.mxu1 %vm607_vm2, %v408_v43  ;;  %6238 = vmatprep.subr.mxu1 %v6606_v58 }
  0xea   : > { %6155 = vmatprep.mubr.msk.f32.mxu1 %vm607_vm2, %v409_v44 }
  0xed   : > { %6156 = vmatmul.mubr.msk.f32.gmra.mxu1 %vm607_vm2, %v410_v45 }
  0xee   : > { %6158 = vmatprep.mubr.msk.f32.mxu1 %vm607_vm2, %v411_v46 }
  0xf1   : > { %6159 = vmatmul.mubr.msk.f32.gmra.mxu1 %vm607_vm2, %v412_v47 }
  0xf2   : > { %6161 = vmatprep.mubr.msk.f32.mxu1 %vm607_vm2, %v413_v48 }
  0xf5   : > { %6162 = vmatmul.mubr.msk.f32.gmra.mxu1 %vm607_vm2, %v414_v49 }
  0xf6   : > { %6164 = vmatprep.mubr.msk.f32.mxu1 %vm607_vm2, %v415_v50 }
  0xf9   : > { %6165 = vmatmul.mubr.msk.f32.gmra.mxu1 %vm607_vm2, %v416_v51 }
  0xfa   : > { %6167 = vmatprep.mubr.msk.f32.mxu1 %vm607_vm2, %v417_v52 }
  0xfd   : > { %6168 = vmatmul.mubr.msk.f32.gmra.mxu1 %vm607_vm2, %v418_v53 }
  0xfe   : > { %6170 = vmatprep.mubr.msk.f32.mxu1 %vm607_vm2, %v419_v54 }
 0x101   : > { %6171 = vmatmul.mubr.msk.f32.gmra.mxu1 %vm607_vm2, %v420_v55 }
 0x102   : > { %6173 = vmatprep.mubr.msk.f32.mxu1 %vm607_vm2, %v421_v56 }
 0x105   : > { %6174 = vmatmul.mubr.msk.f32.gmra.mxu1 %vm607_vm2, %v422_v57 }
 0x106   : > { %6176 = vmatprep.mubr.msk.f32.mxu1 %vm607_vm2, %v423_v23 }
 0x109   : > { %6177 = vmatmul.mubr.msk.f32.gmra.mxu1 %vm607_vm2, %v424_v24  ;;  %v459_v24 = vld [vmem:[%s7763_s4 + $0x80] sm:$0xff] }
 0x10a   : > { %6179 = vmatprep.mubr.msk.f32.mxu1 %vm607_vm2, %v425_v25  ;;  %v460_v25 = vld [vmem:[%s7763_s4 + $0x88] sm:$0xff] }
 0x10d   : > { %6180 = vmatmul.mubr.msk.f32.gmra.mxu1 %vm607_vm2, %v426_v26  ;;  %v462_v26 = vld [vmem:[%s7763_s4 + $0x98] sm:$0xff] }
 0x10e   : > { %6182 = vmatprep.mubr.msk.f32.mxu1 %vm607_vm2, %v427_v27  ;;  %v464_v27 = vld [vmem:[%s7763_s4 + $0xa8] sm:$0xff] }
 0x111   : > { %6183 = vmatmul.mubr.msk.f32.gmra.mxu1 %vm607_vm2, %v428_v28  ;;  %v461_v28 = vld [vmem:[%s7763_s4 + $0x90] sm:$0xff] }
 0x1a9   : > { %v6154_v63 = vpop.f32.mrf.mxu1 }
 0x1aa   : > { %v752_v0 = vadd.f32 %v6154_v63, %v495_v60  ;;  %v430_v63 = vld [vmem:[%s7762_s3 + $0xb8] sm:$0xff] }
 0x1ab   : > { %v746_v1 = vpop.f32.mrf.mxu1 }
 0x1ac   : > { %v747_v2 = vadd.f32 %v746_v1, %v490_v59  ;;  %897 = vxpose.xlu1.b32.start.end [1/1] (short) (narrow) %v752_v0, 8 }
 0x1ad   : > { %v6157_v3 = vpop.f32.mrf.mxu1 }
 0x1ae   : > { %865 = vxpose.xlu0.b32.start.end [1/1] (short) (narrow) %v747_v2, 8  ;;  %v762_v12 = vadd.f32 %v6157_v3, %v505_v62  ;;  %v429_v62 = vld [vmem:[%s7762_s3 + $0xb0] sm:$0xff] }
 0x1af   : > { %v756_v6 = vpop.f32.mrf.mxu1  ;;  %6185 = vmatprep.mubr.msk.f32.mxu1 %vm607_vm2, %v429_v62 }
 0x1b0   : > { %v757_v7 = vadd.f32 %v756_v6, %v500_v61  ;;  %6186 = vmatmul.mubr.msk.f32.gmra.mxu1 %vm607_vm2, %v430_v63 }
 0x1b1   : > { %v6160_v8 = vpop.f32.mrf.mxu1  ;;  %6240 = vmatprep.mubr.msk.f32.mxu1 %vm6607_vm3, %v6606_v58 }
 0x1b2   : > { %v772_v9 = vadd.f32 %v6160_v8, %v515_v5  ;;  %929 = vxpose.xlu0.b32.start.end [1/1] (short) (narrow) %v757_v7, 8 }
 0x1b3   : > { %v766_v10 = vpop.f32.mrf.mxu1 }
 0x1b4   : > { %1025 = vxpose.xlu1.b32.start.end [1/1] (short) (narrow) %v772_v9, 8  ;;  %v767_v17 = vadd.f32 %v766_v10, %v510_v4 }
 0x1b5   : > { %v6163_v14 = vpop.f32.mrf.mxu1 }
 0x1b6   : > { %v782_v15 = vadd.f32 %v6163_v14, %v525_v13  ;;  %961 = vxpose.xlu0.b32.start.end [1/1] (short) (narrow) %v762_v12, 8 }
 0x1b7   : > { %v776_v16 = vpop.f32.mrf.mxu1 }
 0x1b8   : > { %1089 = vxpose.xlu1.b32.start.end [1/1] (short) (narrow) %v782_v15, 8  ;;  %v777_v21 = vadd.f32 %v776_v16, %v520_v11 }
 0x1b9   : > { %v6166_v18 = vpop.f32.mrf.mxu1 }
 0x1ba   : > { %993 = vxpose.xlu0.b32.start.end [1/1] (short) (narrow) %v767_v17, 8  ;;  %v792_v38 = vadd.f32 %v6166_v18, %v535_v29  ;;  %v463_v29 = vld [vmem:[%s7763_s4 + $0xa0] sm:$0xff] }
 0x1bb   : > { %v786_v20 = vpop.f32.mrf.mxu1 }
 0x1bc   : > { %v787_v22 = vadd.f32 %v786_v20, %v530_v19 }
 0x1bd   : > { %v6169_v35 = vpop.f32.mrf.mxu1 }
 0x1be   : > { %6189 = vmatpush3.msra.mxu0 %v787_v22  ;;  %1057 = vxpose.xlu0.b32.start.end [1/1] (short) (narrow) %v777_v21, 8  ;;  %v802_v48 = vadd.f32 %v6169_v35, %v545_v31 }
 0x1bf   : > { %6193 = vmatprep.subr.mxu0 %v6606_v58  ;;  %v796_v43 = vpop.f32.mrf.mxu1 }
 0x1c0   : > { %v797_v45 = vadd.f32 %v796_v43, %v540_v30 }
 0x1c1   : > { %v6172_v47 = vpop.f32.mrf.mxu1 }
 0x1c2   : > { %v812_v54 = vadd.f32 %v6172_v47, %v555_v33 }
 0x1c3   : > { %v806_v50 = vpop.f32.mrf.mxu1 }
 0x1c4   : > { %v807_v51 = vadd.f32 %v806_v50, %v550_v32 }
 0x1c5   : > { %v6175_v52 = vpop.f32.mrf.mxu1 }
 0x1c6   : > { %v822_v60 = vadd.f32 %v6175_v52, %v565_v37 }
 0x1c7   : > { %v816_v55 = vpop.f32.mrf.mxu1 }
 0x1c8   : > { %v817_v57 = vadd.f32 %v816_v55, %v560_v34 }
 0x228   : > { %v913_v44 = vpop.trf.xlu1 }
 0x22a   : > { %v881_v41 = vpop.trf.xlu0 }
 0x22b   : > { %6191 = vmatmul.mubr.msk.f32.vlgmr.msra.gmra.mxu0 %vm1121_vm4, %v881_v41 }
 0x22c   : > { %6194 = vmatpush3.msra.mxu0 %v792_v38  ;;  %6195 = vmatprep.mubr.msk.f32.mxu0 %vm6607_vm3, %v6606_v58 }
 0x22d   : > { %6198 = vmatprep.subr.mxu0 %v6606_v58 }
 0x22e   : > { %v945_v46 = vpop.trf.xlu0 }
 0x22f   : > { %6196 = vmatmul.mubr.msk.f32.vlgmr.msra.gmra.mxu0 %vm1121_vm4, %v913_v44 }
 0x230   : > { %6199 = vmatpush3.msra.mxu0 %v797_v45  ;;  %6200 = vmatprep.mubr.msk.f32.mxu0 %vm6607_vm3, %v6606_v58  ;;  %v1041_v56 = vpop.trf.xlu1 }
 0x231   : > { %6203 = vmatprep.subr.mxu0 %v6606_v58 }
 0x232   : > { %v977_v49 = vpop.trf.xlu0 }
 0x233   : > { %6201 = vmatmul.mubr.msk.f32.vlgmr.msra.gmra.mxu0 %vm1121_vm4, %v945_v46 }
 0x234   : > { %6204 = vmatpush3.msra.mxu0 %v802_v48  ;;  %6205 = vmatprep.mubr.msk.f32.mxu0 %vm6607_vm3, %v6606_v58  ;;  %v1105_v61 = vpop.trf.xlu1 }
 0x235   : > { %6208 = vmatprep.subr.mxu0 %v6606_v58 }
 0x236   : > { %v1009_v53 = vpop.trf.xlu0 }
 0x237   : > { %6206 = vmatmul.mubr.msk.f32.vlgmr.msra.gmra.mxu0 %vm1121_vm4, %v977_v49 }
 0x238   : > { %6209 = vmatpush3.msra.mxu0 %v807_v51  ;;  %6210 = vmatprep.mubr.msk.f32.mxu0 %vm6607_vm3, %v6606_v58 }
 0x239   : > { %6213 = vmatprep.subr.mxu0 %v6606_v58 }
 0x23a   : > { %v1073_v59 = vpop.trf.xlu0 }
 0x23b   : > { %6211 = vmatmul.mubr.msk.f32.vlgmr.msra.gmra.mxu0 %vm1121_vm4, %v1009_v53 }
 0x23c   : > { %6214 = vmatpush3.msra.mxu0 %v812_v54  ;;  %6215 = vmatprep.mubr.msk.f32.mxu0 %vm6607_vm3, %v6606_v58 }
 0x23d   : > { %6218 = vmatprep.subr.mxu0 %v6606_v58 }
 0x23f   : > { %6216 = vmatmul.mubr.msk.f32.vlgmr.msra.gmra.mxu0 %vm1121_vm4, %v1041_v56 }
 0x240   : > { %6219 = vmatpush3.msra.mxu0 %v817_v57  ;;  %6220 = vmatprep.mubr.msk.f32.mxu0 %vm6607_vm3, %v6606_v58 }
 0x241   : > { %6223 = vmatprep.subr.mxu0 %v6606_v58 }
 0x243   : > { %6221 = vmatmul.mubr.msk.f32.vlgmr.msra.gmra.mxu0 %vm1121_vm4, %v1073_v59 }
 0x244   : > { %6224 = vmatpush3.msra.mxu0 %v822_v60  ;;  %6225 = vmatprep.mubr.msk.f32.mxu0 %vm6607_vm3, %v6606_v58 }
 0x245   : > { %6228 = vmatprep.subr.mxu0 %v6606_v58 }
 0x247   : > { %6226 = vmatmul.mubr.msk.f32.vlgmr.msra.gmra.mxu0 %vm1121_vm4, %v1105_v61 }
 0x248   : > { %6230 = vmatprep.mubr.msk.f32.mxu0 %vm6607_vm3, %v6606_v58 }
 0x2eb   : > { %v1191_v0 = vpop.f32.mrf.mxu0 }
 0x2ec   : > { %v1706_v1 = vsel %vm1121_vm4, %v1191_v0, -inf }
 0x2ed   : > { %1707 = vmax.xlane.f32.xlu0 %v1706_v1  ;;  %v6192_v2 = vpop.f32.mrf.mxu0 }
 0x2ef   : > { %v1264_v3 = vpop.f32.mrf.mxu0 }
 0x2f0   : > { %v1709_v4 = vsel %vm1121_vm4, %v1264_v3, -inf }
 0x2f1   : > { %1710 = vmax.xlane.f32.xlu1 %v1709_v4  ;;  %v6197_v5 = vpop.f32.mrf.mxu0 }
 0x2f3   : > { %v1337_v6 = vpop.f32.mrf.mxu0 }
 0x2f4   : > { %v1712_v7 = vsel %vm1121_vm4, %v1337_v6, -inf }
 0x2f5   : > { %1713 = vmax.xlane.f32.xlu0 %v1712_v7  ;;  %v6202_v8 = vpop.f32.mrf.mxu0 }
 0x2f7   : > { %v1410_v9 = vpop.f32.mrf.mxu0 }
 0x2f8   : > { %v1715_v10 = vsel %vm1121_vm4, %v1410_v9, -inf }
 0x2f9   : > { %1716 = vmax.xlane.f32.xlu1 %v1715_v10  ;;  %v6207_v11 = vpop.f32.mrf.mxu0 }
 0x2fa   : > { %v465_v11 = vld [vmem:[%s7763_s4 + $0xb0] sm:$0xff] }
 0x2fb   : > { %v1483_v12 = vpop.f32.mrf.mxu0 }
 0x2fc   : > { %v1718_v13 = vsel %vm1121_vm4, %v1483_v12, -inf }
 0x2fd   : > { %1719 = vmax.xlane.f32.xlu0 %v1718_v13  ;;  %v6212_v14 = vpop.f32.mrf.mxu0  ;;  %v468_v13 = vld [vmem:[%s7763_s4 + $0xc8] sm:$0xff] }
 0x2fe   : > { %v467_v14 = vld [vmem:[%s7763_s4 + $0xc0] sm:$0xff] }
 0x2ff   : > { %v1556_v15 = vpop.f32.mrf.mxu0 }
 0x300   : > { %v1721_v16 = vsel %vm1121_vm4, %v1556_v15, -inf }
 0x301   : > { %1722 = vmax.xlane.f32.xlu1 %v1721_v16  ;;  %v6217_v17 = vpop.f32.mrf.mxu0  ;;  %v471_v16 = vld [vmem:[%s7763_s4 + $0xe0] sm:$0xff] }
 0x302   : > { %v473_v17 = vld [vmem:[%s7763_s4 + $0xf0] sm:$0xff] }
 0x303   : > { %v1629_v18 = vpop.f32.mrf.mxu0 }
 0x304   : > { %v1724_v19 = vsel %vm1121_vm4, %v1629_v18, -inf }
 0x305   : > { %1725 = vmax.xlane.f32.xlu0 %v1724_v19  ;;  %v6222_v20 = vpop.f32.mrf.mxu0  ;;  %v474_v19 = vld [vmem:[%s7763_s4 + $0xf8] sm:$0xff] }
 0x306   : > { %v470_v20 = vld [vmem:[%s7763_s4 + $0xd8] sm:$0xff] }
 0x307   : > { %v1702_v21 = vpop.f32.mrf.mxu0 }
 0x308   : > { %v1727_v22 = vsel %vm1121_vm4, %v1702_v21, -inf }
 0x309   : > { %1728 = vmax.xlane.f32.xlu1 %v1727_v22  ;;  %v6227_v23 = vpop.f32.mrf.mxu0  ;;  %v482_v22 = vld [vmem:[%s7763_s4 + $0x138] sm:$0xff] }
 0x30a   : > { %v480_v23 = vld [vmem:[%s7763_s4 + $0x128] sm:$0xff] }
 0x31a   : > { %569 = vperm.xlu1 %6513, %v459_v24   ;;  %v486_v24 = vld [vmem:[%s7763_s4 + $0x158] sm:$0xff] }
 0x31b   : > { %574 = vperm.xlu0 %6512, %v460_v25   ;;  %v479_v25 = vld [vmem:[%s7763_s4 + $0x120] sm:$0xff] }
 0x31e   : > { %584 = vperm.xlu1 %6513, %v462_v26   ;;  %v485_v26 = vld [vmem:[%s7763_s4 + $0x150] sm:$0xff] }
 0x31f   : > { %594 = vperm.xlu0 %6512, %v464_v27   ;;  %v483_v27 = vld [vmem:[%s7763_s4 + $0x140] sm:$0xff] }
 0x322   : > { %579 = vperm.xlu1 %6513, %v461_v28   ;;  %v484_v28 = vld [vmem:[%s7763_s4 + $0x148] sm:$0xff] }
 0x326   : > { %589 = vperm.xlu1 %6513, %v463_v29   ;;  %v476_v29 = vld [vmem:[%s7763_s4 + $0x108] sm:$0xff] }
 0x376   : > { %v1708_v30 = vpop.xlane.xlu0 %1707 }
 0x377   : > { %v1730_v31 = vsub.f32 %v1191_v0, %v1708_v30  ;;  %v475_v30 = vld [vmem:[%s7763_s4 + $0x100] sm:$0xff] }
 0x379   : > { %v1738_v32 = vmul.f32 1.442695, %v1730_v31  ;;  %v478_v31 = vld [vmem:[%s7763_s4 + $0x118] sm:$0xff] }
 0x37a   : > { %v1711_v33 = vpop.xlane.xlu1 %1710 }
 0x37b   : > { %6516 = vpow2.f32 %v1738_v32  ;;  %v1731_v34 = vsub.f32 %v1264_v3, %v1711_v33  ;;  %v477_v32 = vld [vmem:[%s7763_s4 + $0x110] sm:$0xff]  ;;  %v5831_v33 = vld [vmem:[%s7763_s4 + $0x168] sm:$0xff] }
 0x37d   : > { %v1740_v35 = vmul.f32 1.442695, %v1731_v34  ;;  %v5830_v34 = vld [vmem:[%s7763_s4 + $0x160] sm:$0xff] }
 0x37e   : > { %v1714_v37 = vpop.xlane.xlu0 %1713 }
 0x37f   : > { %6518 = vpow2.f32 %v1740_v35  ;;  %v1732_v38 = vsub.f32 %v1337_v6, %v1714_v37  ;;  %v5833_v35 = vld [vmem:[%s7763_s4 + $0x178] sm:$0xff]  ;;  %v5832_v37 = vld [vmem:[%s7763_s4 + $0x170] sm:$0xff] }
 0x381   : > { %v1742_v41 = vmul.f32 1.442695, %v1732_v38  ;;  %v5835_v38 = vld [vmem:[%s7763_s4 + $0x188] sm:$0xff] }
 0x382   : > { %v1717_v43 = vpop.xlane.xlu1 %1716 }
 0x383   : > { %6520 = vpow2.f32 %v1742_v41  ;;  %v1733_v44 = vsub.f32 %v1410_v9, %v1717_v43  ;;  %v5834_v41 = vld [vmem:[%s7763_s4 + $0x180] sm:$0xff]  ;;  %v5837_v43 = vld [vmem:[%s7763_s4 + $0x198] sm:$0xff] }
 0x385   : > { %v1744_v45 = vmul.f32 1.442695, %v1733_v44  ;;  %v5836_v44 = vld [vmem:[%s7763_s4 + $0x190] sm:$0xff] }
 0x386   : > { %v1720_v46 = vpop.xlane.xlu0 %1719 }
 0x387   : > { %6522 = vpow2.f32 %v1744_v45  ;;  %v1734_v47 = vsub.f32 %v1483_v12, %v1720_v46  ;;  %v466_v12 = vld [vmem:[%s7763_s4 + $0xb8] sm:$0xff]  ;;  %v5839_v45 = vld [vmem:[%s7763_s4 + $0x1a8] sm:$0xff]  ;;  %v5838_v46 = vld [vmem:[%s7763_s4 + $0x1a0] sm:$0xff] }
 0x388   : > { %v6911_v48 = vpop.eup %6516 }
 0x389   : > { %v1746_v49 = vmul.f32 1.442695, %v1734_v47  ;;  %v1754_v50 = vsel %vm1121_vm4, %v6911_v48, 0.0  ;;  %v5841_v47 = vld [vmem:[%s7763_s4 + $0x1b8] sm:$0xff] }
 0x38a   : > { %v1723_v51 = vpop.xlane.xlu1 %1722  ;;  %1755 = vadd.xlane.f32.xlu1 %v1754_v50  ;;  %v5843_v50 = vld [vmem:[%s7763_s4 + $0x1c8] sm:$0xff] }
 0x38b   : > { %6524 = vpow2.f32 %v1746_v49  ;;  %v1735_v52 = vsub.f32 %v1556_v15, %v1723_v51  ;;  %v472_v15 = vld [vmem:[%s7763_s4 + $0xe8] sm:$0xff]  ;;  %v5840_v49 = vld [vmem:[%s7763_s4 + $0x1b0] sm:$0xff]  ;;  %v5842_v51 = vld [vmem:[%s7763_s4 + $0x1c0] sm:$0xff] }
 0x38c   : > { %v6915_v53 = vpop.eup %6518 }
 0x38d   : > { %v1748_v54 = vmul.f32 1.442695, %v1735_v52  ;;  %v1757_v55 = vsel %vm1121_vm4, %v6915_v53, 0.0  ;;  %v5845_v52 = vld [vmem:[%s7763_s4 + $0x1d8] sm:$0xff] }
 0x38e   : > { %1758 = vadd.xlane.f32.xlu0 %v1757_v55  ;;  %v1726_v56 = vpop.xlane.xlu0 %1725  ;;  %v5844_v55 = vld [vmem:[%s7763_s4 + $0x1d0] sm:$0xff] }
 0x38f   : > { %6526 = vpow2.f32 %v1748_v54  ;;  %v1736_v57 = vsub.f32 %v1629_v18, %v1726_v56  ;;  %v469_v18 = vld [vmem:[%s7763_s4 + $0xd0] sm:$0xff] }
 0x390   : > { %v6919_v59 = vpop.eup %6520 }
 0x391   : > { %v1750_v60 = vmul.f32 1.442695, %v1736_v57  ;;  %v1760_v61 = vsel %vm1121_vm4, %v6919_v59, 0.0 }
 0x392   : > { %v1729_v62 = vpop.xlane.xlu1 %1728  ;;  %1761 = vadd.xlane.f32.xlu0 %v1760_v61 }
 0x393   : > { %6528 = vpow2.f32 %v1750_v60  ;;  %v1737_v63 = vsub.f32 %v1702_v21, %v1729_v62  ;;  %v481_v21 = vld [vmem:[%s7763_s4 + $0x130] sm:$0xff] }
 0x394   : > { %v6923_v0 = vpop.eup %6522 }
 0x395   : > { %v1752_v1 = vmul.f32 1.442695, %v1737_v63  ;;  %v1763_v2 = vsel %vm1121_vm4, %v6923_v0, 0.0 }
 0x396   : > { %1764 = vadd.xlane.f32.xlu1 %v1763_v2  ;;  %v570_v54 = vpop.permute.xlu1 %569  ;;  %v575_v60 = vpop.permute.xlu0 %574 }
 0x397   : > { %6530 = vpow2.f32 %v1752_v1 }
 0x398   : > { %v6927_v3 = vpop.eup %6524 }
 0x399   : > { %v1766_v4 = vsel %vm1121_vm4, %v6927_v3, 0.0 }
 0x39a   : > { %1767 = vadd.xlane.f32.xlu0 %v1766_v4  ;;  %v585_v56 = vpop.permute.xlu1 %584  ;;  %v7057_v62 = vpop.permute.xlu0 %594 }
 0x39c   : > { %v6931_v5 = vpop.eup %6526 }
 0x39d   : > { %v1769_v6 = vsel %vm1121_vm4, %v6931_v5, 0.0 }
 0x39e   : > { %1770 = vadd.xlane.f32.xlu1 %v1769_v6  ;;  %v580_v57 = vpop.permute.xlu1 %579  ;;  %v6178_v6 = vpop.f32.mrf.mxu1 }
 0x3a0   : > { %v6935_v7 = vpop.eup %6528 }
 0x3a1   : > { %v1772_v8 = vsel %vm1121_vm4, %v6935_v7, 0.0 }
 0x3a2   : > { %1773 = vadd.xlane.f32.xlu0 %v1772_v8  ;;  %v590_v61 = vpop.permute.xlu1 %589 }
 0x3a4   : > { %v6939_v9 = vpop.eup %6530 }
 0x3a5   : > { %v1775_v10 = vsel %vm1121_vm4, %v6939_v9, 0.0 }
 0x3a6   : > { %1776 = vadd.xlane.f32.xlu1 %v1775_v10 }
 0x3b7   : > { %599 = vperm.xlu1 %6513, %v465_v11  }
 0x3b8   : > { %604 = vperm.xlu0 %6512, %v466_v12   ;;  %v826_v12 = vpop.f32.mrf.mxu1 }
 0x3bb   : > { %2409 = vperm.xlu1 %6513, %v468_v13  }
 0x3bc   : > { %2404 = vperm.xlu0 %6512, %v467_v14   ;;  %v827_v14 = vadd.f32 %v826_v12, %v570_v54 }
 0x3bf   : > { %2526 = vperm.xlu1 %6513, %v472_v15  }
 0x3c0   : > { %2521 = vperm.xlu0 %6512, %v471_v16  }
 0x3c3   : > { %2531 = vperm.xlu1 %6513, %v473_v17   ;;  %v6181_v17 = vpop.f32.mrf.mxu1 }
 0x3c4   : > { %2414 = vperm.xlu0 %6512, %v469_v18   ;;  %v832_v18 = vadd.f32 %v6178_v6, %v575_v60  ;;  %v436_v6 = vld [vmem:[%s7762_s3 + $0xe8] sm:$0xff] }
 0x3c7   : > { %2536 = vperm.xlu1 %6513, %v474_v19  }
 0x3c8   : > { %2419 = vperm.xlu0 %6512, %v470_v20  }
 0x3cb   : > { %2695 = vperm.xlu1 %6513, %v481_v21  }
 0x3cc   : > { %2700 = vperm.xlu0 %6512, %v482_v22  }
 0x3cf   : > { %2690 = vperm.xlu1 %6513, %v480_v23  }
 0x3d0   : > { %2724 = vperm.xlu0 %6512, %v486_v24  }
 0x3d3   : > { %2685 = vperm.xlu1 %6513, %v479_v25  }
 0x3d4   : > { %2719 = vperm.xlu0 %6512, %v485_v26   ;;  %v842_v26 = vadd.f32 %v6181_v17, %v585_v56  ;;  %v433_v56 = vld [vmem:[%s7762_s3 + $0xd0] sm:$0xff] }
 0x3d7   : > { %2709 = vperm.xlu1 %6513, %v483_v27  }
 0x3d8   : > { %2714 = vperm.xlu0 %6512, %v484_v28  }
 0x3db   : > { %2796 = vperm.xlu1 %6513, %v476_v29  }
 0x3dc   : > { %2791 = vperm.xlu0 %6512, %v475_v30  }
 0x3df   : > { %2806 = vperm.xlu1 %6513, %v478_v31  }
 0x3e0   : > { %2801 = vperm.xlu0 %6512, %v477_v32  }
 0x3e3   : > { %3049 = vperm.xlu1 %6513, %v5831_v33  }
 0x3e4   : > { %3044 = vperm.xlu0 %6512, %v5830_v34  }
 0x3e7   : > { %3059 = vperm.xlu1 %6513, %v5833_v35  }
 0x3e8   : > { %3054 = vperm.xlu0 %6512, %v5832_v37  }
 0x3eb   : > { %3069 = vperm.xlu1 %6513, %v5835_v38  }
 0x3ec   : > { %3064 = vperm.xlu0 %6512, %v5834_v41  }
 0x3ef   : > { %3079 = vperm.xlu1 %6513, %v5837_v43  }
 0x3f0   : > { %3074 = vperm.xlu0 %6512, %v5836_v44  }
 0x3f3   : > { %3089 = vperm.xlu1 %6513, %v5839_v45  }
 0x3f4   : > { %3084 = vperm.xlu0 %6512, %v5838_v46  }
 0x3f7   : > { %3099 = vperm.xlu1 %6513, %v5841_v47  }
 0x3f8   : > { %3094 = vperm.xlu0 %6512, %v5840_v49  }
 0x3fb   : > { %3109 = vperm.xlu1 %6513, %v5843_v50  }
 0x3fc   : > { %3104 = vperm.xlu0 %6512, %v5842_v51  }
 0x3ff   : > { %3119 = vperm.xlu1 %6513, %v5845_v52  }
 0x400   : > { %3114 = vperm.xlu0 %6512, %v5844_v55   ;;  %v432_v55 = vld [vmem:[%s7762_s3 + $0xc8] sm:$0xff] }
 0x413   : > { %v1756_v63 = vpop.xlane.xlu1 %1755 }
 0x414   : > { %6532 = vrcp.f32 %v1756_v63 }
 0x417   : > { %v1759_v1 = vpop.xlane.xlu0 %1758 }
 0x418   : > { %6534 = vrcp.f32 %v1759_v1 }
 0x41b   : > { %v1762_v2 = vpop.xlane.xlu0 %1761 }
 0x41c   : > { %6536 = vrcp.f32 %v1762_v2 }
 0x41f   : > { %v1765_v4 = vpop.xlane.xlu1 %1764 }
 0x420   : > { %6538 = vrcp.f32 %v1765_v4 }
 0x421   : > { %v6533_v8 = vpop.eup %6532 }
 0x422   : > { %v1779_v10 = vmul.f32 %v6533_v8, %v6911_v48  ;;  %v437_v8 = vld [vmem:[%s7762_s3 + $0xf0] sm:$0xff] }
 0x423   : > { %v1768_v11 = vpop.xlane.xlu0 %1767 }
 0x424   : > { %6540 = vrcp.f32 %v1768_v11  ;;  %6229 = vmatpush3.xpose.msk.msra.mxu0 %vm1121_vm4, %v1779_v10  ;;  %v438_v10 = vld [vmem:[%s7762_s3 + $0xf8] sm:$0xff]  ;;  %v439_v11 = vld [vmem:[%s7762_s3 + $0x100] sm:$0xff] }
 0x425   : > { %v6535_v13 = vpop.eup %6534  ;;  %6233 = vmatprep.subr.mxu0 %v6606_v58 }
 0x426   : > { %v1781_v15 = vmul.f32 %v6535_v13, %v6915_v53  ;;  %v836_v53 = vpop.f32.mrf.mxu1 }
 0x427   : > { %6231 = vmatmul.mubr.msk.f32.vlgmr.msra.gmra.mxu0 %vm1121_vm4, %v827_v14  ;;  %v1771_v16 = vpop.xlane.xlu1 %1770  ;;  %v837_v22 = vadd.f32 %v836_v53, %v580_v57 }
 0x428   : > { %6542 = vrcp.f32 %v1771_v16  ;;  %6234 = vmatpush3.xpose.msk.msra.mxu0 %vm1121_vm4, %v1781_v15  ;;  %6235 = vmatprep.mubr.msk.f32.mxu0 %vm6607_vm3, %v6606_v58 }
 0x429   : > { %v6537_v48 = vpop.eup %6536  ;;  %6243 = vmatprep.subr.mxu0 %v6606_v58 }
 0x42a   : > { %v1783_v19 = vmul.f32 %v6537_v48, %v6919_v59  ;;  %v6184_v59 = vpop.f32.mrf.mxu1 }
 0x42b   : > { %6236 = vmatmul.mubr.msk.f32.vlgmr.msra.gmra.mxu0 %vm1121_vm4, %v832_v18  ;;  %v1774_v20 = vpop.xlane.xlu0 %1773  ;;  %v852_v32 = vadd.f32 %v6184_v59, %v7057_v62  ;;  %v435_v62 = vld [vmem:[%s7762_s3 + $0xe0] sm:$0xff] }
 0x42c   : > { %6544 = vrcp.f32 %v1774_v20  ;;  %6239 = vmatpush3.xpose.msk.msra.mxu1 %vm1121_vm4, %v1783_v19  ;;  %6245 = vmatprep.mubr.msk.f32.mxu0 %vm6607_vm3, %v6606_v58  ;;  %v846_v27 = vpop.f32.mrf.mxu1 }
 0x42d   : > { %v6539_v21 = vpop.eup %6538  ;;  %6248 = vmatprep.subr.mxu1 %v6606_v58  ;;  %v847_v29 = vadd.f32 %v846_v27, %v590_v61  ;;  %v434_v61 = vld [vmem:[%s7762_s3 + $0xd8] sm:$0xff] }
 0x42e   : > { %v1785_v23 = vmul.f32 %v6539_v21, %v6923_v0  ;;  %v6187_v30 = vpop.f32.mrf.mxu1 }
 0x42f   : > { %v1777_v24 = vpop.xlane.xlu1 %1776  ;;  %6241 = vmatmul.mubr.msk.f32.vlgmr.msra.gmra.mxu1 %vm1121_vm4, %v837_v22 }
 0x430   : > { %6546 = vrcp.f32 %v1777_v24  ;;  %6244 = vmatpush3.xpose.msk.msra.mxu0 %vm1121_vm4, %v1785_v23  ;;  %6250 = vmatprep.mubr.msk.f32.mxu1 %vm6607_vm3, %v6606_v58  ;;  %v856_v33 = vpop.f32.mrf.mxu1 }
 0x431   : > { %v6541_v25 = vpop.eup %6540  ;;  %6253 = vmatprep.subr.mxu0 %v6606_v58 }
 0x432   : > { %v1787_v28 = vmul.f32 %v6541_v25, %v6927_v3 }
 0x433   : > { %6246 = vmatmul.mubr.msk.f32.vlgmr.msra.gmra.mxu0 %vm1121_vm4, %v842_v26  ;;  %v600_v34 = vpop.permute.xlu1 %599  ;;  %v605_v38 = vpop.permute.xlu0 %604 }
 0x434   : > { %6249 = vmatpush3.xpose.msk.msra.mxu1 %vm1121_vm4, %v1787_v28  ;;  %6255 = vmatprep.mubr.msk.f32.mxu0 %vm6607_vm3, %v6606_v58  ;;  %v857_v37 = vadd.f32 %v856_v33, %v600_v34  ;;  %v862_v43 = vadd.f32 %v6187_v30, %v605_v38 }
 0x435   : > { %v6543_v0 = vpop.eup %6542  ;;  %6258 = vmatprep.subr.mxu1 %v6606_v58 }
 0x436   : > { %v1789_v31 = vmul.f32 %v6543_v0, %v6931_v5 }
 0x437   : > { %6251 = vmatmul.mubr.msk.f32.vlgmr.msra.gmra.mxu1 %vm1121_vm4, %v847_v29  ;;  %v2405_v12 = vpop.permute.xlu0 %2404  ;;  %v2410_v15 = vpop.permute.xlu1 %2409 }
 0x438   : > { %6254 = vmatpush3.xpose.msk.msra.mxu0 %vm1121_vm4, %v1789_v31  ;;  %6260 = vmatprep.mubr.msk.f32.mxu1 %vm6607_vm3, %v6606_v58 }
 0x439   : > { %v6545_v3 = vpop.eup %6544  ;;  %6263 = vmatprep.subr.mxu0 %v6606_v58 }
 0x43a   : > { %v1791_v35 = vmul.f32 %v6545_v3, %v6935_v7  ;;  %v431_v7 = vld [vmem:[%s7762_s3 + $0xc0] sm:$0xff] }
 0x43b   : > { %6256 = vmatmul.mubr.msk.f32.vlgmr.msra.gmra.mxu0 %vm1121_vm4, %v852_v32  ;;  %v2522_v13 = vpop.permute.xlu0 %2521  ;;  %v2527_v25 = vpop.permute.xlu1 %2526 }
 0x43c   : > { %6259 = vmatpush3.xpose.msk.msra.mxu1 %vm1121_vm4, %v1791_v35  ;;  %6265 = vmatprep.mubr.msk.f32.mxu0 %vm6607_vm3, %v6606_v58 }
 0x43d   : > { %v6547_v5 = vpop.eup %6546 }
 0x43e   : > { %v1793_v41 = vmul.f32 %v6547_v5, %v6939_v9 }
 0x43f   : > { %6261 = vmatmul.mubr.msk.f32.vlgmr.msra.gmra.mxu1 %vm1121_vm4, %v857_v37  ;;  %v2415_v14 = vpop.permute.xlu0 %2414  ;;  %v2532_v3 = vpop.permute.xlu1 %2531 }
 0x440   : > { %6264 = vmatpush3.xpose.msk.msra.mxu0 %vm1121_vm4, %v1793_v41  ;;  %6276 = vmatprep.mubr.msk.f32.mxu1 %vm607_vm2, %v431_v7 }
 0x443   : > { %6266 = vmatmul.mubr.msk.f32.vlgmr.msra.gmra.mxu0 %vm1121_vm4, %v862_v43  ;;  %v2420_v19 = vpop.permute.xlu0 %2419  ;;  %v2537_v41 = vpop.permute.xlu1 %2536 }
 0x4e7   : > { %v1866_v44 = vpop.f32.mrf.mxu0 }
 0x4e9   : > { %v6232_v45 = vpop.f32.mrf.mxu0 }
 0x4eb   : > { %v1942_v46 = vpop.f32.mrf.mxu0 }
 0x4ed   : > { %v6237_v47 = vpop.f32.mrf.mxu0 }
 0x4ef   : > { %v2018_v49 = vpop.f32.mrf.mxu1 }
 0x4f1   : > { %v6242_v50 = vpop.f32.mrf.mxu1 }
 0x4f3   : > { %v2094_v9 = vpop.f32.mrf.mxu0 }
 0x4f4   : > { %6268 = vmatprep.subr.mxu1 %v2094_v9 }
 0x4f5   : > { %v6247_v51 = vpop.f32.mrf.mxu0  ;;  %6269 = vmatpush3.msra.mxu1 %v2094_v9 }
 0x4f6   : > { %6270 = vmatprep.subr.mxu1 %v2018_v49 }
 0x4f7   : > { %v2170_v52 = vpop.f32.mrf.mxu1  ;;  %6271 = vmatpush3.msra.mxu1 %v2018_v49 }
 0x4f8   : > { %6272 = vmatprep.subr.mxu1 %v1942_v46 }
 0x4f9   : > { %v6252_v54 = vpop.f32.mrf.mxu1  ;;  %6273 = vmatpush3.msra.mxu1 %v1942_v46 }
 0x4fa   : > { %6274 = vmatprep.subr.mxu1 %v1866_v44 }
 0x4fb   : > { %v2246_v57 = vpop.f32.mrf.mxu0  ;;  %6275 = vmatpush3.msra.mxu1 %v1866_v44 }
 0x4fc   : > { %6277 = vmatmul.mubr.msk.f32.vlgmr.msra.gmra.mxu1 %vm607_vm2, %v432_v55 }
 0x4fd   : > { %v6257_v60 = vpop.f32.mrf.mxu0  ;;  %6279 = vmatprep.mubr.msk.f32.mxu1 %vm607_vm2, %v433_v56 }
 0x4ff   : > { %v2322_v63 = vpop.f32.mrf.mxu1 }
 0x500   : > { %6280 = vmatmul.mubr.msk.f32.gmra.mxu1 %vm607_vm2, %v434_v61 }
 0x501   : > { %v6262_v1 = vpop.f32.mrf.mxu1  ;;  %6290 = vmatprep.mubr.msk.f32.mxu1 %vm607_vm2, %v435_v62 }
 0x503   : > { %v2398_v2 = vpop.f32.mrf.mxu0 }
 0x504   : > { %6282 = vmatprep.subr.mxu1 %v2398_v2 }
 0x505   : > { %v6267_v4 = vpop.f32.mrf.mxu0  ;;  %6283 = vmatpush3.msra.mxu1 %v2398_v2 }
 0x506   : > { %6284 = vmatprep.subr.mxu1 %v2322_v63 }
 0x507   : > { %6285 = vmatpush3.msra.mxu1 %v2322_v63 }
 0x508   : > { %6286 = vmatprep.subr.mxu1 %v2246_v57 }
 0x509   : > { %6287 = vmatpush3.msra.mxu1 %v2246_v57 }
 0x50a   : > { %6288 = vmatprep.subr.mxu1 %v2170_v52 }
 0x50b   : > { %6289 = vmatpush3.msra.mxu1 %v2170_v52 }
 0x50c   : > { %6291 = vmatmul.mubr.msk.f32.vlgmr.msra.gmra.mxu1 %vm607_vm2, %v436_v6 }
 0x50d   : > { %6293 = vmatprep.mubr.msk.f32.mxu1 %vm607_vm2, %v437_v8 }
 0x510   : > { %6294 = vmatmul.mubr.msk.f32.gmra.mxu1 %vm607_vm2, %v438_v10 }
 0x511   : > { %6304 = vmatprep.mubr.msk.f32.mxu1 %vm607_vm2, %v439_v11 }
 0x5bc   : > { %v6278_v16 = vpop.f32.mrf.mxu1 }
 0x5bd   : > { %v2506_v17 = vadd.f32 %v6278_v16, %v2410_v15 }
 0x5be   : > { %v2500_v48 = vpop.f32.mrf.mxu1 }
 0x5bf   : > { %v2501_v18 = vadd.f32 %v2500_v48, %v2405_v12  ;;  %v2637_v53 = vadd.f32 %v2506_v17, %v6745_v40 }
 0x5c0   : > { %v6281_v20 = vpop.f32.mrf.mxu1 }
 0x5c1   : > { %v2636_v21 = vadd.f32 %v2501_v18, %v6749_v42  ;;  %v2516_v22 = vadd.f32 %v6281_v20, %v2420_v19  ;;  %v2641_v26 = vsel %vm1121_vm4, %v2637_v53, 0.0 }
 0x5c2   : > { %v2510_v23 = vpop.f32.mrf.mxu1 }
 0x5c3   : > { %v2640_v24 = vsel %vm1121_vm4, %v2636_v21, 0.0  ;;  %v2511_v59 = vadd.f32 %v2510_v23, %v2415_v14  ;;  %v2639_v27 = vadd.f32 %v2516_v22, %v6739_v36 }
 0x5c4   : > { %v2642_v0 = vadd.f32 %v2641_v26, %v2640_v24 }
 0x5c5   : > { %v2638_v28 = vadd.f32 %v2511_v59, %v6741_v39  ;;  %v2645_v31 = vsel %vm1121_vm4, %v2639_v27, 0.0 }
 0x5c7   : > { %v2643_v29 = vsel %vm1121_vm4, %v2638_v28, 0.0 }
 0x5c8   : > { %v2644_v30 = vadd.f32 %v2643_v29, %v2642_v0 }
 0x5ca   : > { %v2646_v32 = vadd.f32 %v2645_v31, %v2644_v30 }
 0x5cc   : > { %v2647_v33 = vrot.slane %v2646_v32, 4  ;;  %v6292_v34 = vpop.f32.mrf.mxu1 }
 0x5cd   : > { %v2623_v35 = vadd.f32 %v6292_v34, %v2527_v25 }
 0x5ce   : > { %v2648_v5 = vadd.f32 %v2647_v33, %v2646_v32  ;;  %v2617_v37 = vpop.f32.mrf.mxu1 }
 0x5cf   : > { %v2618_v38 = vadd.f32 %v2617_v37, %v2522_v13  ;;  %v2732_v44 = vadd.f32 %v2623_v35, %v6745_v40 }
 0x5d0   : > { %v2649_v43 = vrot.slane %v2648_v5, 2  ;;  %v6295_v7 = vpop.f32.mrf.mxu1 }
 0x5d1   : > { %v2731_v45 = vadd.f32 %v2618_v38, %v6749_v42  ;;  %v2633_v46 = vadd.f32 %v6295_v7, %v2537_v41  ;;  %v2736_v52 = vsel %vm1121_vm4, %v2732_v44, 0.0 }
 0x5d2   : > { %v2650_v47 = vadd.f32 %v2649_v43, %v2648_v5  ;;  %v2627_v49 = vpop.f32.mrf.mxu1 }
 0x5d3   : > { %v2735_v50 = vsel %vm1121_vm4, %v2731_v45, 0.0  ;;  %v2628_v9 = vadd.f32 %v2627_v49, %v2532_v3  ;;  %v2734_v54 = vadd.f32 %v2633_v46, %v6739_v36 }
 0x5d4   : > { %v2651_v51 = vrot.slane %v2650_v47, 1  ;;  %v2737_v57 = vadd.f32 %v2736_v52, %v2735_v50  ;;  %v7170_v52 = vpop.permute.xlu0 %2700 }
 0x5d5   : > { %v2733_v55 = vadd.f32 %v2628_v9, %v6741_v39  ;;  %v2740_v42 = vsel %vm1121_vm4, %v2734_v54, 0.0 }
 0x5d6   : > { %v2652_v56 = vadd.f32 %v2651_v51, %v2650_v47 }
 0x5d7   : > { %v2738_v60 = vsel %vm1121_vm4, %v2733_v55, 0.0 }
 0x5d8   : > { %v2654_v40 = vmul.f32 0.03125, %v2652_v56  ;;  %v2739_v61 = vadd.f32 %v2738_v60, %v2737_v57  ;;  %v7174_v56 = vpop.permute.xlu0 %2724 }
 0x5da   : > { %v7154_v62 = vsub.f32 %v2636_v21, %v2654_v40  ;;  %v7156_v63 = vsub.f32 %v2637_v53, %v2654_v40  ;;  %v2657_v1 = vsub.f32 %v2638_v28, %v2654_v40  ;;  %v2658_v2 = vsub.f32 %v2639_v27, %v2654_v40 }
 0x5db   : > { %v2741_v4 = vadd.f32 %v2740_v42, %v2739_v61 }
 0x5dc   : > { %v2659_v36 = vmul.f32 %v7154_v62, %v7154_v62  ;;  %v2660_v39 = vmul.f32 %v7156_v63, %v7156_v63  ;;  %v2661_v6 = vmul.f32 %v2657_v1, %v2657_v1  ;;  %v2662_v10 = vmul.f32 %v2658_v2, %v2658_v2  ;;  %v7178_v42 = vpop.permute.xlu0 %2719 }
 0x5dd   : > { %v2742_v8 = vrot.slane %v2741_v4, 4 }
 0x5de   : > { %v2663_v11 = vsel %vm1121_vm4, %v2659_v36, 0.0  ;;  %v2664_v12 = vsel %vm1121_vm4, %v2660_v39, 0.0  ;;  %v2666_v15 = vsel %vm1121_vm4, %v2661_v6, 0.0  ;;  %v2668_v48 = vsel %vm1121_vm4, %v2662_v10, 0.0 }
 0x5df   : > { %v2665_v13 = vadd.f32 %v2664_v12, %v2663_v11  ;;  %v2743_v14 = vadd.f32 %v2742_v8, %v2741_v4 }
 0x5e1   : > { %v2667_v16 = vadd.f32 %v2666_v15, %v2665_v13  ;;  %v2744_v17 = vrot.slane %v2743_v14, 2 }
 0x5e3   : > { %v2669_v18 = vadd.f32 %v2668_v48, %v2667_v16  ;;  %v2745_v19 = vadd.f32 %v2744_v17, %v2743_v14 }
 0x5e5   : > { %v2670_v20 = vrot.slane %v2669_v18, 4  ;;  %v2746_v53 = vrot.slane %v2745_v19, 1 }
 0x5e7   : > { %v2671_v21 = vadd.f32 %v2670_v20, %v2669_v18  ;;  %v2747_v22 = vadd.f32 %v2746_v53, %v2745_v19  ;;  %v7194_v18 = vpop.permute.xlu0 %2714 }
 0x5e9   : > { %v2672_v23 = vrot.slane %v2671_v21, 2  ;;  %v2748_v24 = vmul.f32 0.03125, %v2747_v22 }
 0x5eb   : > { %v2673_v59 = vadd.f32 %v2672_v23, %v2671_v21  ;;  %v2749_v25 = vsub.f32 %v2731_v45, %v2748_v24  ;;  %v2750_v26 = vsub.f32 %v2732_v44, %v2748_v24  ;;  %v2751_v27 = vsub.f32 %v2733_v55, %v2748_v24 }
 0x5ec   : > { %v2752_v28 = vsub.f32 %v2734_v54, %v2748_v24  ;;  %v7172_v54 = vpop.permute.xlu1 %2695 }
 0x5ed   : > { %v2753_v0 = vmul.f32 %v2749_v25, %v2749_v25  ;;  %v2754_v29 = vmul.f32 %v2750_v26, %v2750_v26  ;;  %v2755_v30 = vmul.f32 %v2751_v27, %v2751_v27  ;;  %v2674_v31 = vrot.slane %v2673_v59, 1 }
 0x5ee   : > { %v2756_v3 = vmul.f32 %v2752_v28, %v2752_v28 }
 0x5ef   : > { %v2757_v32 = vsel %vm1121_vm4, %v2753_v0, 0.0  ;;  %v2758_v33 = vsel %vm1121_vm4, %v2754_v29, 0.0  ;;  %v2760_v35 = vsel %vm1121_vm4, %v2755_v30, 0.0  ;;  %v2675_v37 = vadd.f32 %v2674_v31, %v2673_v59  ;;  %v442_v0 = vld [vmem:[%s7762_s3 + $0x118] sm:$0xff]  ;;  %v5794_v29 = vld [vmem:[%s7762_s3 + $0x120] sm:$0xff]  ;;  %v2792_v31 = vpop.permute.xlu0 %2791 }
 0x5f0   : > { %v2759_v34 = vadd.f32 %v2758_v33, %v2757_v32  ;;  %v2762_v38 = vsel %vm1121_vm4, %v2756_v3, 0.0  ;;  %v7176_v57 = vpop.permute.xlu1 %2690  ;;  %6318 = vmatprep.mubr.msk.f32.mxu0 %vm607_vm2, %v5794_v29 }
 0x5f1   : > { %v2676_v7 = vmul.f32 0.03125, %v2675_v37 }
 0x5f2   : > { %v2761_v5 = vadd.f32 %v2760_v35, %v2759_v34 }
 0x5f3   : > { %v2677_v46 = vadd.f32 1e-05, %v2676_v7 }
 0x5f4   : > { %v2763_v41 = vadd.f32 %v2762_v38, %v2761_v5  ;;  %v7182_v11 = vpop.permute.xlu1 %2685 }
 0x5f5   : > { %6548 = vrsqrt.f32 %v2677_v46 }
 0x5f6   : > { %v2764_v43 = vrot.slane %v2763_v41, 4 }
 0x5f8   : > { %v2765_v44 = vadd.f32 %v2764_v43, %v2763_v41  ;;  %v7199_v21 = vpop.permute.xlu1 %2709  ;;  %v2802_v43 = vpop.permute.xlu0 %2801 }
 0x5fa   : > { %v2766_v45 = vrot.slane %v2765_v44, 2 }
 0x5fc   : > { %v2767_v47 = vadd.f32 %v2766_v45, %v2765_v44  ;;  %v2797_v30 = vpop.permute.xlu1 %2796 }
 0x5fe   : > { %v2768_v49 = vrot.slane %v2767_v47, 1 }
 0x600   : > { %v2769_v50 = vadd.f32 %v2768_v49, %v2767_v47  ;;  %v2807_v35 = vpop.permute.xlu1 %2806 }
 0x602   : > { %v2770_v9 = vmul.f32 0.03125, %v2769_v50  ;;  %v6549_v55 = vpop.eup %6548 }
 0x603   : > { %v2682_v60 = vmul.f32 %v6549_v55, %v2658_v2  ;;  %v2681_v40 = vmul.f32 %v6549_v55, %v2657_v1  ;;  %v2680_v36 = vmul.f32 %v6549_v55, %v7156_v63  ;;  %v2679_v12 = vmul.f32 %v6549_v55, %v7154_v62 }
 0x604   : > { %v2771_v51 = vadd.f32 1e-05, %v2770_v9 }
 0x605   : > { %v2706_v4 = vmul.f32 %v7170_v52, %v2682_v60  ;;  %v2705_v2 = vmul.f32 %v7172_v54, %v2681_v40  ;;  %v2704_v15 = vmul.f32 %v7176_v57, %v2680_v36  ;;  %v2703_v53 = vmul.f32 %v7182_v11, %v2679_v12 }
 0x606   : > { %6550 = vrsqrt.f32 %v2771_v51 }
 0x607   : > { %v2730_v63 = vadd.f32 %v7174_v56, %v2706_v4  ;;  %v2729_v19 = vadd.f32 %v7178_v42, %v2705_v2  ;;  %v2728_v23 = vadd.f32 %v7194_v18, %v2704_v15 }
 0x613   : > { %v6551_v61 = vpop.eup %6550 }
 0x614   : > { %v2775_v39 = vmul.f32 %v6551_v61, %v2751_v27  ;;  %v2776_v6 = vmul.f32 %v6551_v61, %v2752_v28  ;;  %v2774_v8 = vmul.f32 %v6551_v61, %v2750_v26  ;;  %v2773_v10 = vmul.f32 %v6551_v61, %v2749_v25  ;;  %v440_v27 = vld [vmem:[%s7762_s3 + $0x108] sm:$0xff]  ;;  %v441_v28 = vld [vmem:[%s7762_s3 + $0x110] sm:$0xff] }
 0x615   : > { %v2727_v25 = vadd.f32 %v7199_v21, %v2703_v53 }
 0x616   : > { %v2780_v13 = vmul.f32 %v2776_v6, %v7170_v52  ;;  %v2779_v1 = vmul.f32 %v2775_v39, %v7172_v54  ;;  %v2778_v14 = vmul.f32 %v2774_v8, %v7176_v57  ;;  %v2777_v48 = vmul.f32 %v2773_v10, %v7182_v11 }
 0x618   : > { %v2784_v16 = vadd.f32 %v2780_v13, %v7174_v56  ;;  %v2783_v17 = vadd.f32 %v2779_v1, %v7178_v42  ;;  %v2782_v20 = vadd.f32 %v2778_v14, %v7194_v18  ;;  %v2781_v24 = vadd.f32 %v2777_v48, %v7199_v21 }
 0x61a   : > { %v2788_v62 = vadd.f32 %v2784_v16, %v2730_v63  ;;  %v2787_v22 = vadd.f32 %v2783_v17, %v2729_v19  ;;  %v2786_v59 = vadd.f32 %v2782_v20, %v2728_v23  ;;  %v2785_v26 = vadd.f32 %v2781_v24, %v2727_v25 }
 0x61c   : > { %6296 = vmatprep.subr.mxu1 %v2788_v62 }
 0x61d   : > { %6297 = vmatpush3.msra.mxu1 %v2788_v62 }
 0x61e   : > { %6298 = vmatprep.subr.mxu1 %v2787_v22 }
 0x61f   : > { %6299 = vmatpush3.msra.mxu1 %v2787_v22 }
 0x620   : > { %6300 = vmatprep.subr.mxu1 %v2786_v59 }
 0x621   : > { %6301 = vmatpush3.msra.mxu1 %v2786_v59 }
 0x622   : > { %6302 = vmatprep.subr.mxu1 %v2785_v26 }
 0x623   : > { %6303 = vmatpush3.msra.mxu1 %v2785_v26 }
 0x624   : > { %6305 = vmatmul.mubr.msk.f32.vlgmr.msra.gmra.mxu1 %vm607_vm2, %v440_v27  ;;  %6354 = vmatprep.subr.mxu1 %v6606_v58 }
 0x625   : > { %6307 = vmatprep.mubr.msk.f32.mxu1 %vm607_vm2, %v441_v28 }
 0x628   : > { %6308 = vmatmul.mubr.msk.f32.gmra.mxu1 %vm607_vm2, %v442_v0 }
 0x629   : > { %6356 = vmatprep.mubr.msk.f32.mxu1 %vm6607_vm3, %v6606_v58 }
 0x6e4   : > { %v6306_v3 = vpop.f32.mrf.mxu1 }
 0x6e5   : > { %v2893_v32 = vadd.f32 %v6306_v3, %v2797_v30 }
 0x6e6   : > { %v2887_v33 = vpop.f32.mrf.mxu1 }
 0x6e7   : > { %v2888_v34 = vadd.f32 %v2887_v33, %v2792_v31  ;;  %v2907_v37 = vadd.f32 %v2893_v32, %v2786_v59 }
 0x6e8   : > { %v6309_v5 = vpop.f32.mrf.mxu1 }
 0x6e9   : > { %v2906_v38 = vadd.f32 %v2888_v34, %v2785_v26  ;;  %v2903_v41 = vadd.f32 %v6309_v5, %v2807_v35  ;;  %v2911_v46 = vsel %vm1121_vm4, %v2907_v37, 0.0 }
 0x6ea   : > { %v2897_v7 = vpop.f32.mrf.mxu1 }
 0x6eb   : > { %v2910_v44 = vsel %vm1121_vm4, %v2906_v38, 0.0  ;;  %v2898_v45 = vadd.f32 %v2897_v7, %v2802_v43  ;;  %v2909_v47 = vadd.f32 %v2903_v41, %v2788_v62  ;;  %v5802_v41 = vld [vmem:[%s7762_s3 + $0x160] sm:$0xff]  ;;  %v5803_v43 = vld [vmem:[%s7762_s3 + $0x168] sm:$0xff]  ;;  %v5804_v7 = vld [vmem:[%s7762_s3 + $0x170] sm:$0xff] }
 0x6ec   : > { %v2912_v50 = vadd.f32 %v2911_v46, %v2910_v44  ;;  %v5805_v44 = vld [vmem:[%s7762_s3 + $0x178] sm:$0xff]  ;;  %v5807_v46 = vld [vmem:[%s7762_s3 + $0x188] sm:$0xff] }
 0x6ed   : > { %v2908_v49 = vadd.f32 %v2898_v45, %v2787_v22  ;;  %v2915_v55 = vsel %vm1121_vm4, %v2909_v47, 0.0  ;;  %v5806_v45 = vld [vmem:[%s7762_s3 + $0x180] sm:$0xff] }
 0x6ef   : > { %v2913_v9 = vsel %vm1121_vm4, %v2908_v49, 0.0 }
 0x6f0   : > { %v2914_v51 = vadd.f32 %v2913_v9, %v2912_v50  ;;  %v3050_v50 = vpop.permute.xlu1 %3049  ;;  %v3045_v9 = vpop.permute.xlu0 %3044 }
 0x6f2   : > { %v2916_v60 = vadd.f32 %v2915_v55, %v2914_v51 }
 0x6f4   : > { %v2917_v40 = vrot.slane %v2916_v60, 4  ;;  %v3060_v51 = vpop.permute.xlu1 %3059  ;;  %v3055_v55 = vpop.permute.xlu0 %3054 }
 0x6f6   : > { %v2918_v61 = vadd.f32 %v2917_v40, %v2916_v60 }
 0x6f8   : > { %v2919_v4 = vrot.slane %v2918_v61, 2 }
 0x6fa   : > { %v2920_v36 = vadd.f32 %v2919_v4, %v2918_v61 }
 0x6fc   : > { %v2921_v39 = vrot.slane %v2920_v36, 1 }
 0x6fe   : > { %v2922_v6 = vadd.f32 %v2921_v39, %v2920_v36  ;;  %v3070_v39 = vpop.permute.xlu1 %3069 }
 0x700   : > { %v2923_v8 = vmul.f32 0.03125, %v2922_v6  ;;  %v3065_v6 = vpop.permute.xlu0 %3064 }
 0x702   : > { %v2924_v10 = vsub.f32 %v2906_v38, %v2923_v8  ;;  %v2925_v12 = vsub.f32 %v2907_v37, %v2923_v8  ;;  %v2926_v13 = vsub.f32 %v2908_v49, %v2923_v8  ;;  %v2927_v2 = vsub.f32 %v2909_v47, %v2923_v8  ;;  %v5801_v38 = vld [vmem:[%s7762_s3 + $0x158] sm:$0xff]  ;;  %v5808_v47 = vld [vmem:[%s7762_s3 + $0x190] sm:$0xff] }
 0x703   : > { %v5809_v49 = vld [vmem:[%s7762_s3 + $0x198] sm:$0xff] }
 0x704   : > { %v2928_v1 = vmul.f32 %v2924_v10, %v2924_v10  ;;  %v2929_v14 = vmul.f32 %v2925_v12, %v2925_v12  ;;  %v2930_v15 = vmul.f32 %v2926_v13, %v2926_v13  ;;  %v2931_v63 = vmul.f32 %v2927_v2, %v2927_v2 }
 0x706   : > { %v2932_v16 = vsel %vm1121_vm4, %v2928_v1, 0.0  ;;  %v2933_v17 = vsel %vm1121_vm4, %v2929_v14, 0.0  ;;  %v2935_v62 = vsel %vm1121_vm4, %v2930_v15, 0.0  ;;  %v2937_v20 = vsel %vm1121_vm4, %v2931_v63, 0.0  ;;  %v3080_v1 = vpop.permute.xlu1 %3079  ;;  %v3075_v15 = vpop.permute.xlu0 %3074 }
 0x707   : > { %v2934_v48 = vadd.f32 %v2933_v17, %v2932_v16 }
 0x709   : > { %v2936_v19 = vadd.f32 %v2935_v62, %v2934_v48 }
 0x70b   : > { %v2938_v53 = vadd.f32 %v2937_v20, %v2936_v19  ;;  %v3085_v19 = vpop.permute.xlu0 %3084 }
 0x70d   : > { %v2939_v22 = vrot.slane %v2938_v53, 4 }
 0x70f   : > { %v2940_v23 = vadd.f32 %v2939_v22, %v2938_v53 }
 0x711   : > { %v2941_v24 = vrot.slane %v2940_v23, 2 }
 0x713   : > { %v2942_v59 = vadd.f32 %v2941_v24, %v2940_v23  ;;  %v5810_v23 = vld [vmem:[%s7762_s3 + $0x1a0] sm:$0xff]  ;;  %v5811_v24 = vld [vmem:[%s7762_s3 + $0x1a8] sm:$0xff] }
 0x715   : > { %v2943_v25 = vrot.slane %v2942_v59, 1 }
 0x717   : > { %v2944_v26 = vadd.f32 %v2943_v25, %v2942_v59  ;;  %v5812_v59 = vld [vmem:[%s7762_s3 + $0x1b0] sm:$0xff]  ;;  %v5813_v25 = vld [vmem:[%s7762_s3 + $0x1b8] sm:$0xff] }
 0x719   : > { %v2945_v27 = vmul.f32 0.03125, %v2944_v26  ;;  %v5814_v26 = vld [vmem:[%s7762_s3 + $0x1c0] sm:$0xff] }
 0x71b   : > { %v2946_v28 = vadd.f32 1e-05, %v2945_v27  ;;  %v5815_v27 = vld [vmem:[%s7762_s3 + $0x1c8] sm:$0xff] }
 0x71d   : > { %6552 = vrsqrt.f32 %v2946_v28  ;;  %v3090_v28 = vpop.permute.xlu1 %3089 }
 0x72a   : > { %v6553_v0 = vpop.eup %6552 }
 0x72b   : > { %v2950_v29 = vmul.f32 %v6553_v0, %v2926_v13  ;;  %v2951_v30 = vmul.f32 %v6553_v0, %v2927_v2  ;;  %v2949_v31 = vmul.f32 %v6553_v0, %v2925_v12  ;;  %v2948_v33 = vmul.f32 %v6553_v0, %v2924_v10  ;;  %v3095_v0 = vpop.permute.xlu0 %3094 }
 0x72d   : > { %v2954_v3 = vmul.f32 %v2950_v29, %v7172_v54  ;;  %v2955_v32 = vmul.f32 %v2951_v30, %v7170_v52  ;;  %v2953_v35 = vmul.f32 %v2949_v31, %v7176_v57  ;;  %v2952_v37 = vmul.f32 %v2948_v33, %v7182_v11  ;;  %v5796_v57 = vld [vmem:[%s7762_s3 + $0x130] sm:$0xff]  ;;  %v5798_v11 = vld [vmem:[%s7762_s3 + $0x140] sm:$0xff]  ;;  %v3100_v29 = vpop.permute.xlu1 %3099 }
 0x72f   : > { %v7234_v34 = vadd.f32 %v2955_v32, %v7174_v56  ;;  %v7239_v5 = vadd.f32 %v2954_v3, %v7178_v42  ;;  %v7245_v54 = vadd.f32 %v2953_v35, %v7194_v18  ;;  %v7250_v52 = vadd.f32 %v2952_v37, %v7199_v21  ;;  %v5795_v56 = vld [vmem:[%s7762_s3 + $0x128] sm:$0xff]  ;;  %v5797_v42 = vld [vmem:[%s7762_s3 + $0x138] sm:$0xff]  ;;  %v5800_v21 = vld [vmem:[%s7762_s3 + $0x150] sm:$0xff]  ;;  %v3105_v30 = vpop.permute.xlu0 %3104 }
 0x730   : > { %v5799_v18 = vld [vmem:[%s7762_s3 + $0x148] sm:$0xff] }
 0x731   : > { %6310 = vmatprep.subr.mxu0 %v7234_v34  ;;  %v3110_v31 = vpop.permute.xlu1 %3109 }
 0x732   : > { %6311 = vmatpush3.msra.mxu0 %v7234_v34 }
 0x733   : > { %6312 = vmatprep.subr.mxu0 %v7239_v5  ;;  %v3115_v3 = vpop.permute.xlu0 %3114 }
 0x734   : > { %6313 = vmatpush3.msra.mxu0 %v7239_v5 }
 0x735   : > { %6314 = vmatprep.subr.mxu0 %v7245_v54  ;;  %v3120_v33 = vpop.permute.xlu1 %3119 }
 0x736   : > { %6315 = vmatpush3.msra.mxu0 %v7245_v54 }
 0x737   : > { %6316 = vmatprep.subr.mxu0 %v7250_v52 }
 0x738   : > { %6317 = vmatpush3.msra.mxu0 %v7250_v52 }
 0x739   : > { %6319 = vmatmul.mubr.msk.f32.vlgmr.msra.gmra.mxu0 %vm607_vm2, %v5795_v56  ;;  %6409 = vmatprep.subr.mxu0 %v6606_v58 }
 0x73a   : > { %6321 = vmatprep.mubr.msk.f32.mxu0 %vm607_vm2, %v5796_v57 }
 0x73d   : > { %6322 = vmatmul.mubr.msk.f32.gmra.mxu0 %vm607_vm2, %v5797_v42 }
 0x73e   : > { %6324 = vmatprep.mubr.msk.f32.mxu0 %vm607_vm2, %v5798_v11 }
 0x741   : > { %6325 = vmatmul.mubr.msk.f32.gmra.mxu0 %vm607_vm2, %v5799_v18 }
 0x742   : > { %6327 = vmatprep.mubr.msk.f32.mxu0 %vm607_vm2, %v5800_v21 }
 0x745   : > { %6328 = vmatmul.mubr.msk.f32.gmra.mxu0 %vm607_vm2, %v5801_v38 }
 0x746   : > { %6330 = vmatprep.mubr.msk.f32.mxu0 %vm607_vm2, %v5802_v41 }
 0x749   : > { %6331 = vmatmul.mubr.msk.f32.gmra.mxu0 %vm607_vm2, %v5803_v43 }
 0x74a   : > { %6333 = vmatprep.mubr.msk.f32.mxu0 %vm607_vm2, %v5804_v7 }
 0x74d   : > { %6334 = vmatmul.mubr.msk.f32.gmra.mxu0 %vm607_vm2, %v5805_v44 }
 0x74e   : > { %6336 = vmatprep.mubr.msk.f32.mxu0 %vm607_vm2, %v5806_v45 }
 0x751   : > { %6337 = vmatmul.mubr.msk.f32.gmra.mxu0 %vm607_vm2, %v5807_v46 }
 0x752   : > { %6339 = vmatprep.mubr.msk.f32.mxu0 %vm607_vm2, %v5808_v47 }
 0x755   : > { %6340 = vmatmul.mubr.msk.f32.gmra.mxu0 %vm607_vm2, %v5809_v49 }
 0x756   : > { %6342 = vmatprep.mubr.msk.f32.mxu0 %vm607_vm2, %v5810_v23 }
 0x759   : > { %6343 = vmatmul.mubr.msk.f32.gmra.mxu0 %vm607_vm2, %v5811_v24  ;;  %v5846_v24 = vld [vmem:[%s7763_s4 + $0x1e0] sm:$0xff] }
 0x75a   : > { %6345 = vmatprep.mubr.msk.f32.mxu0 %vm607_vm2, %v5812_v59  ;;  %v5847_v59 = vld [vmem:[%s7763_s4 + $0x1e8] sm:$0xff] }
 0x75d   : > { %6346 = vmatmul.mubr.msk.f32.gmra.mxu0 %vm607_vm2, %v5813_v25  ;;  %v5849_v25 = vld [vmem:[%s7763_s4 + $0x1f8] sm:$0xff] }
 0x75e   : > { %6348 = vmatprep.mubr.msk.f32.mxu0 %vm607_vm2, %v5814_v26  ;;  %v5851_v26 = vld [vmem:[%s7763_s4 + $0x208] sm:$0xff] }
 0x761   : > { %6349 = vmatmul.mubr.msk.f32.gmra.mxu0 %vm607_vm2, %v5815_v27  ;;  %v5848_v27 = vld [vmem:[%s7763_s4 + $0x1f0] sm:$0xff] }
 0x7f9   : > { %v6320_v60 = vpop.f32.mrf.mxu0 }
 0x7fa   : > { %v3306_v40 = vadd.f32 %v6320_v60, %v3050_v50  ;;  %v5817_v60 = vld [vmem:[%s7762_s3 + $0x1d8] sm:$0xff] }
 0x7fb   : > { %v3300_v61 = vpop.f32.mrf.mxu0 }
 0x7fc   : > { %v3301_v4 = vadd.f32 %v3300_v61, %v3045_v9  ;;  %3451 = vxpose.xlu1.b32.start.end [1/1] (short) (narrow) %v3306_v40, 8 }
 0x7fd   : > { %v6323_v36 = vpop.f32.mrf.mxu0 }
 0x7fe   : > { %3419 = vxpose.xlu0.b32.start.end [1/1] (short) (narrow) %v3301_v4, 8  ;;  %v3316_v14 = vadd.f32 %v6323_v36, %v3060_v51 }
 0x7ff   : > { %v3310_v8 = vpop.f32.mrf.mxu0 }
 0x800   : > { %v3311_v10 = vadd.f32 %v3310_v8, %v3055_v55  ;;  %v5816_v55 = vld [vmem:[%s7762_s3 + $0x1d0] sm:$0xff] }
 0x801   : > { %v6326_v12 = vpop.f32.mrf.mxu0  ;;  %6351 = vmatprep.mubr.msk.f32.mxu0 %vm607_vm2, %v5816_v55 }
 0x802   : > { %v3326_v13 = vadd.f32 %v6326_v12, %v3070_v39  ;;  %3483 = vxpose.xlu0.b32.start.end [1/1] (short) (narrow) %v3311_v10, 8  ;;  %6352 = vmatmul.mubr.msk.f32.gmra.mxu0 %vm607_vm2, %v5817_v60 }
 0x803   : > { %v3320_v2 = vpop.f32.mrf.mxu0  ;;  %6411 = vmatprep.mubr.msk.f32.mxu0 %vm6607_vm3, %v6606_v58 }
 0x804   : > { %3579 = vxpose.xlu1.b32.start.end [1/1] (short) (narrow) %v3326_v13, 8  ;;  %v3321_v48 = vadd.f32 %v3320_v2, %v3065_v6 }
 0x805   : > { %v6329_v63 = vpop.f32.mrf.mxu0 }
 0x806   : > { %v3336_v16 = vadd.f32 %v6329_v63, %v3080_v1  ;;  %3515 = vxpose.xlu0.b32.start.end [1/1] (short) (narrow) %v3316_v14, 8 }
 0x807   : > { %v3330_v17 = vpop.f32.mrf.mxu0 }
 0x808   : > { %3643 = vxpose.xlu1.b32.start.end [1/1] (short) (narrow) %v3336_v16, 8  ;;  %v3331_v53 = vadd.f32 %v3330_v17, %v3075_v15 }
 0x809   : > { %v6332_v62 = vpop.f32.mrf.mxu0 }
 0x80a   : > { %3547 = vxpose.xlu0.b32.start.end [1/1] (short) (narrow) %v3321_v48, 8  ;;  %v3346_v35 = vadd.f32 %v6332_v62, %v3090_v28  ;;  %v5850_v28 = vld [vmem:[%s7763_s4 + $0x200] sm:$0xff] }
 0x80b   : > { %v3340_v20 = vpop.f32.mrf.mxu0 }
 0x80c   : > { %v3341_v22 = vadd.f32 %v3340_v20, %v3085_v19 }
 0x80d   : > { %v6335_v32 = vpop.f32.mrf.mxu0 }
 0x80e   : > { %3611 = vxpose.xlu0.b32.start.end [1/1] (short) (narrow) %v3331_v53, 8  ;;  %6355 = vmatpush3.msra.mxu1 %v3341_v22  ;;  %v3356_v21 = vadd.f32 %v6335_v32, %v3100_v29 }
 0x80f   : > { %6359 = vmatprep.subr.mxu1 %v6606_v58  ;;  %v3350_v56 = vpop.f32.mrf.mxu0 }
 0x810   : > { %v3351_v42 = vadd.f32 %v3350_v56, %v3095_v0 }
 0x811   : > { %v6338_v18 = vpop.f32.mrf.mxu0 }
 0x812   : > { %v3366_v45 = vadd.f32 %v6338_v18, %v3110_v31 }
 0x813   : > { %v3360_v41 = vpop.f32.mrf.mxu0 }
 0x814   : > { %v3361_v43 = vadd.f32 %v3360_v41, %v3105_v30 }
 0x815   : > { %v6341_v7 = vpop.f32.mrf.mxu0 }
 0x816   : > { %v3376_v9 = vadd.f32 %v6341_v7, %v3120_v33 }
 0x817   : > { %v3370_v46 = vpop.f32.mrf.mxu0 }
 0x818   : > { %v3371_v49 = vadd.f32 %v3370_v46, %v3115_v3 }
 0x878   : > { %v3467_v57 = vpop.trf.xlu1 }
 0x87a   : > { %v3435_v37 = vpop.trf.xlu0 }
 0x87b   : > { %6357 = vmatmul.mubr.msk.f32.vlgmr.msra.gmra.mxu1 %vm1121_vm4, %v3435_v37 }
 0x87c   : > { %6360 = vmatpush3.msra.mxu1 %v3346_v35  ;;  %6361 = vmatprep.mubr.msk.f32.mxu1 %vm6607_vm3, %v6606_v58 }
 0x87d   : > { %6364 = vmatprep.subr.mxu1 %v6606_v58 }
 0x87e   : > { %v3499_v11 = vpop.trf.xlu0 }
 0x87f   : > { %6362 = vmatmul.mubr.msk.f32.vlgmr.msra.gmra.mxu1 %vm1121_vm4, %v3467_v57 }
 0x880   : > { %6365 = vmatpush3.msra.mxu1 %v3351_v42  ;;  %6366 = vmatprep.mubr.msk.f32.mxu1 %vm6607_vm3, %v6606_v58  ;;  %v3595_v47 = vpop.trf.xlu1 }
 0x881   : > { %6369 = vmatprep.subr.mxu1 %v6606_v58 }
 0x882   : > { %v3531_v38 = vpop.trf.xlu0 }
 0x883   : > { %6367 = vmatmul.mubr.msk.f32.vlgmr.msra.gmra.mxu1 %vm1121_vm4, %v3499_v11 }
 0x884   : > { %6370 = vmatpush3.msra.mxu1 %v3356_v21  ;;  %6371 = vmatprep.mubr.msk.f32.mxu1 %vm6607_vm3, %v6606_v58  ;;  %v3659_v51 = vpop.trf.xlu1 }
 0x885   : > { %6374 = vmatprep.subr.mxu1 %v6606_v58 }
 0x886   : > { %v3563_v44 = vpop.trf.xlu0 }
 0x887   : > { %6372 = vmatmul.mubr.msk.f32.vlgmr.msra.gmra.mxu1 %vm1121_vm4, %v3531_v38 }
 0x888   : > { %6375 = vmatpush3.msra.mxu1 %v3361_v43  ;;  %6376 = vmatprep.mubr.msk.f32.mxu1 %vm6607_vm3, %v6606_v58 }
 0x889   : > { %6379 = vmatprep.subr.mxu1 %v6606_v58 }
 0x88a   : > { %v3627_v50 = vpop.trf.xlu0 }
 0x88b   : > { %6377 = vmatmul.mubr.msk.f32.vlgmr.msra.gmra.mxu1 %vm1121_vm4, %v3563_v44 }
 0x88c   : > { %6380 = vmatpush3.msra.mxu1 %v3366_v45  ;;  %6381 = vmatprep.mubr.msk.f32.mxu1 %vm6607_vm3, %v6606_v58 }
 0x88d   : > { %6384 = vmatprep.subr.mxu1 %v6606_v58 }
 0x88f   : > { %6382 = vmatmul.mubr.msk.f32.vlgmr.msra.gmra.mxu1 %vm1121_vm4, %v3595_v47 }
 0x890   : > { %6385 = vmatpush3.msra.mxu1 %v3371_v49  ;;  %6386 = vmatprep.mubr.msk.f32.mxu1 %vm6607_vm3, %v6606_v58 }
 0x891   : > { %6389 = vmatprep.subr.mxu1 %v6606_v58 }
 0x893   : > { %6387 = vmatmul.mubr.msk.f32.vlgmr.msra.gmra.mxu1 %vm1121_vm4, %v3627_v50 }
 0x894   : > { %6390 = vmatpush3.msra.mxu1 %v3376_v9  ;;  %6391 = vmatprep.mubr.msk.f32.mxu1 %vm6607_vm3, %v6606_v58 }
 0x895   : > { %6394 = vmatprep.subr.mxu1 %v6606_v58 }
 0x897   : > { %6392 = vmatmul.mubr.msk.f32.vlgmr.msra.gmra.mxu1 %vm1121_vm4, %v3659_v51 }
 0x898   : > { %6396 = vmatprep.mubr.msk.f32.mxu1 %vm6607_vm3, %v6606_v58 }
 0x93b   : > { %v3744_v40 = vpop.f32.mrf.mxu1 }
 0x93c   : > { %v4259_v61 = vsel %vm1121_vm4, %v3744_v40, -inf }
 0x93d   : > { %4260 = vmax.xlane.f32.xlu0 %v4259_v61  ;;  %v6358_v4 = vpop.f32.mrf.mxu1 }
 0x93f   : > { %v3817_v36 = vpop.f32.mrf.mxu1 }
 0x940   : > { %v4262_v39 = vsel %vm1121_vm4, %v3817_v36, -inf }
 0x941   : > { %4263 = vmax.xlane.f32.xlu1 %v4262_v39  ;;  %v6363_v6 = vpop.f32.mrf.mxu1 }
 0x943   : > { %v3890_v8 = vpop.f32.mrf.mxu1 }
 0x944   : > { %v4265_v10 = vsel %vm1121_vm4, %v3890_v8, -inf }
 0x945   : > { %4266 = vmax.xlane.f32.xlu0 %v4265_v10  ;;  %v6368_v12 = vpop.f32.mrf.mxu1 }
 0x947   : > { %v3963_v13 = vpop.f32.mrf.mxu1 }
 0x948   : > { %v4268_v2 = vsel %vm1121_vm4, %v3963_v13, -inf }
 0x949   : > { %4269 = vmax.xlane.f32.xlu1 %v4268_v2  ;;  %v6373_v1 = vpop.f32.mrf.mxu1 }
 0x94a   : > { %v5852_v1 = vld [vmem:[%s7763_s4 + $0x210] sm:$0xff] }
 0x94b   : > { %v4036_v14 = vpop.f32.mrf.mxu1 }
 0x94c   : > { %v4271_v15 = vsel %vm1121_vm4, %v4036_v14, -inf }
 0x94d   : > { %4272 = vmax.xlane.f32.xlu0 %v4271_v15  ;;  %v6378_v63 = vpop.f32.mrf.mxu1  ;;  %v5855_v15 = vld [vmem:[%s7763_s4 + $0x228] sm:$0xff] }
 0x94e   : > { %v5854_v63 = vld [vmem:[%s7763_s4 + $0x220] sm:$0xff] }
 0x94f   : > { %v4109_v16 = vpop.f32.mrf.mxu1 }
 0x950   : > { %v4274_v17 = vsel %vm1121_vm4, %v4109_v16, -inf }
 0x951   : > { %4275 = vmax.xlane.f32.xlu1 %v4274_v17  ;;  %v6383_v48 = vpop.f32.mrf.mxu1  ;;  %v5858_v17 = vld [vmem:[%s7763_s4 + $0x240] sm:$0xff] }
 0x952   : > { %v5860_v48 = vld [vmem:[%s7763_s4 + $0x250] sm:$0xff] }
 0x953   : > { %v4182_v62 = vpop.f32.mrf.mxu1 }
 0x954   : > { %v4277_v19 = vsel %vm1121_vm4, %v4182_v62, -inf }
 0x955   : > { %4278 = vmax.xlane.f32.xlu0 %v4277_v19  ;;  %v6388_v20 = vpop.f32.mrf.mxu1  ;;  %v5861_v19 = vld [vmem:[%s7763_s4 + $0x258] sm:$0xff] }
 0x956   : > { %v5857_v20 = vld [vmem:[%s7763_s4 + $0x238] sm:$0xff] }
 0x957   : > { %v4255_v53 = vpop.f32.mrf.mxu1 }
 0x958   : > { %v4280_v22 = vsel %vm1121_vm4, %v4255_v53, -inf }
 0x959   : > { %4281 = vmax.xlane.f32.xlu1 %v4280_v22  ;;  %v6393_v23 = vpop.f32.mrf.mxu1  ;;  %v5869_v22 = vld [vmem:[%s7763_s4 + $0x298] sm:$0xff] }
 0x95a   : > { %v5867_v23 = vld [vmem:[%s7763_s4 + $0x288] sm:$0xff] }
 0x96a   : > { %3124 = vperm.xlu1 %6513, %v5846_v24   ;;  %v5873_v24 = vld [vmem:[%s7763_s4 + $0x2b8] sm:$0xff] }
 0x96b   : > { %3129 = vperm.xlu0 %6512, %v5847_v59   ;;  %v5866_v59 = vld [vmem:[%s7763_s4 + $0x280] sm:$0xff] }
 0x96e   : > { %3139 = vperm.xlu1 %6513, %v5849_v25   ;;  %v5872_v25 = vld [vmem:[%s7763_s4 + $0x2b0] sm:$0xff] }
 0x96f   : > { %3149 = vperm.xlu0 %6512, %v5851_v26   ;;  %v5870_v26 = vld [vmem:[%s7763_s4 + $0x2a0] sm:$0xff] }
 0x972   : > { %3134 = vperm.xlu1 %6513, %v5848_v27   ;;  %v5871_v27 = vld [vmem:[%s7763_s4 + $0x2a8] sm:$0xff] }
 0x976   : > { %3144 = vperm.xlu1 %6513, %v5850_v28   ;;  %v5863_v28 = vld [vmem:[%s7763_s4 + $0x268] sm:$0xff] }
 0x9c6   : > { %v4261_v0 = vpop.xlane.xlu0 %4260 }
 0x9c7   : > { %v4283_v29 = vsub.f32 %v3744_v40, %v4261_v0  ;;  %v5862_v0 = vld [vmem:[%s7763_s4 + $0x260] sm:$0xff] }
 0x9c9   : > { %v4291_v30 = vmul.f32 1.442695, %v4283_v29  ;;  %v5865_v29 = vld [vmem:[%s7763_s4 + $0x278] sm:$0xff] }
 0x9ca   : > { %v4264_v31 = vpop.xlane.xlu1 %4263 }
 0x9cb   : > { %6554 = vpow2.f32 %v4291_v30  ;;  %v4284_v3 = vsub.f32 %v3817_v36, %v4264_v31  ;;  %v5864_v30 = vld [vmem:[%s7763_s4 + $0x270] sm:$0xff] }
 0x9cd   : > { %v4293_v32 = vmul.f32 1.442695, %v4284_v3 }
 0x9ce   : > { %v4267_v33 = vpop.xlane.xlu0 %4266 }
 0x9cf   : > { %6556 = vpow2.f32 %v4293_v32  ;;  %v4285_v35 = vsub.f32 %v3890_v8, %v4267_v33 }
 0x9d1   : > { %v4295_v37 = vmul.f32 1.442695, %v4285_v35 }
 0x9d2   : > { %v4270_v56 = vpop.xlane.xlu1 %4269 }
 0x9d3   : > { %6558 = vpow2.f32 %v4295_v37  ;;  %v4286_v57 = vsub.f32 %v3963_v13, %v4270_v56 }
 0x9d5   : > { %v4297_v42 = vmul.f32 1.442695, %v4286_v57 }
 0x9d6   : > { %v4273_v11 = vpop.xlane.xlu0 %4272 }
 0x9d7   : > { %6560 = vpow2.f32 %v4297_v42  ;;  %v4287_v18 = vsub.f32 %v4036_v14, %v4273_v11  ;;  %v5853_v14 = vld [vmem:[%s7763_s4 + $0x218] sm:$0xff] }
 0x9d8   : > { %v7408_v21 = vpop.eup %6554 }
 0x9d9   : > { %v4299_v38 = vmul.f32 1.442695, %v4287_v18  ;;  %v4307_v41 = vsel %vm1121_vm4, %v7408_v21, 0.0  ;;  %v6344_v18 = vpop.f32.mrf.mxu0 }
 0x9da   : > { %v4276_v43 = vpop.xlane.xlu1 %4275  ;;  %4308 = vadd.xlane.f32.xlu1 %v4307_v41 }
 0x9db   : > { %6562 = vpow2.f32 %v4299_v38  ;;  %v4288_v7 = vsub.f32 %v4109_v16, %v4276_v43  ;;  %v5859_v16 = vld [vmem:[%s7763_s4 + $0x248] sm:$0xff] }
 0x9dc   : > { %v7412_v44 = vpop.eup %6556 }
 0x9dd   : > { %v4301_v45 = vmul.f32 1.442695, %v4288_v7  ;;  %v4310_v46 = vsel %vm1121_vm4, %v7412_v44, 0.0  ;;  %v3380_v7 = vpop.f32.mrf.mxu0 }
 0x9de   : > { %4311 = vadd.xlane.f32.xlu0 %v4310_v46  ;;  %v4279_v47 = vpop.xlane.xlu0 %4278 }
 0x9df   : > { %6564 = vpow2.f32 %v4301_v45  ;;  %v4289_v49 = vsub.f32 %v4182_v62, %v4279_v47  ;;  %v5856_v62 = vld [vmem:[%s7763_s4 + $0x230] sm:$0xff] }
 0x9e0   : > { %v7416_v50 = vpop.eup %6558 }
 0x9e1   : > { %v4303_v9 = vmul.f32 1.442695, %v4289_v49  ;;  %v4313_v51 = vsel %vm1121_vm4, %v7416_v50, 0.0 }
 0x9e2   : > { %v4282_v55 = vpop.xlane.xlu1 %4281  ;;  %4314 = vadd.xlane.f32.xlu0 %v4313_v51 }
 0x9e3   : > { %6566 = vpow2.f32 %v4303_v9  ;;  %v4290_v60 = vsub.f32 %v4255_v53, %v4282_v55  ;;  %v5868_v53 = vld [vmem:[%s7763_s4 + $0x290] sm:$0xff]  ;;  %v6347_v9 = vpop.f32.mrf.mxu0 }
 0x9e4   : > { %v7420_v40 = vpop.eup %6560 }
 0x9e5   : > { %v4305_v61 = vmul.f32 1.442695, %v4290_v60  ;;  %v4316_v4 = vsel %vm1121_vm4, %v7420_v40, 0.0 }
 0x9e6   : > { %4317 = vadd.xlane.f32.xlu1 %v4316_v4  ;;  %v3125_v31 = vpop.permute.xlu1 %3124  ;;  %v3130_v33 = vpop.permute.xlu0 %3129 }
 0x9e7   : > { %6568 = vpow2.f32 %v4305_v61  ;;  %v3381_v46 = vadd.f32 %v3380_v7, %v3125_v31  ;;  %v3386_v51 = vadd.f32 %v6344_v18, %v3130_v33  ;;  %v5823_v18 = vld [vmem:[%s7762_s3 + $0x208] sm:$0xff] }
 0x9e8   : > { %v7424_v36 = vpop.eup %6562 }
 0x9e9   : > { %v4319_v39 = vsel %vm1121_vm4, %v7424_v36, 0.0 }
 0x9ea   : > { %4320 = vadd.xlane.f32.xlu0 %v4319_v39  ;;  %v3140_v3 = vpop.permute.xlu1 %3139  ;;  %v7506_v37 = vpop.permute.xlu0 %3149 }
 0x9ec   : > { %v7428_v6 = vpop.eup %6564 }
 0x9ed   : > { %v4322_v8 = vsel %vm1121_vm4, %v7428_v6, 0.0 }
 0x9ee   : > { %4323 = vadd.xlane.f32.xlu1 %v4322_v8  ;;  %v3135_v32 = vpop.permute.xlu1 %3134 }
 0x9f0   : > { %v7432_v10 = vpop.eup %6566 }
 0x9f1   : > { %v4325_v12 = vsel %vm1121_vm4, %v7432_v10, 0.0 }
 0x9f2   : > { %4326 = vadd.xlane.f32.xlu0 %v4325_v12  ;;  %v3145_v35 = vpop.permute.xlu1 %3144 }
 0x9f4   : > { %v7436_v13 = vpop.eup %6568 }
 0x9f5   : > { %v4328_v2 = vsel %vm1121_vm4, %v7436_v13, 0.0 }
 0x9f6   : > { %4329 = vadd.xlane.f32.xlu1 %v4328_v2  ;;  %v3396_v2 = vadd.f32 %v6347_v9, %v3140_v3  ;;  %v5819_v3 = vld [vmem:[%s7762_s3 + $0x1e8] sm:$0xff] }
 0xa07   : > { %3154 = vperm.xlu1 %6513, %v5852_v1  }
 0xa08   : > { %3159 = vperm.xlu0 %6512, %v5853_v14  }
 0xa0b   : > { %4962 = vperm.xlu1 %6513, %v5855_v15  }
 0xa0c   : > { %4957 = vperm.xlu0 %6512, %v5854_v63  }
 0xa0f   : > { %5079 = vperm.xlu1 %6513, %v5859_v16  }
 0xa10   : > { %5074 = vperm.xlu0 %6512, %v5858_v17  }
 0xa13   : > { %5084 = vperm.xlu1 %6513, %v5860_v48  }
 0xa14   : > { %4967 = vperm.xlu0 %6512, %v5856_v62  }
 0xa17   : > { %5089 = vperm.xlu1 %6513, %v5861_v19  }
 0xa18   : > { %4972 = vperm.xlu0 %6512, %v5857_v20  }
 0xa1b   : > { %5247 = vperm.xlu1 %6513, %v5868_v53  }
 0xa1c   : > { %5252 = vperm.xlu0 %6512, %v5869_v22  }
 0xa1f   : > { %5242 = vperm.xlu1 %6513, %v5867_v23  }
 0xa20   : > { %5276 = vperm.xlu0 %6512, %v5873_v24   ;;  %v5822_v24 = vld [vmem:[%s7762_s3 + $0x200] sm:$0xff] }
 0xa23   : > { %5237 = vperm.xlu1 %6513, %v5866_v59  }
 0xa24   : > { %5271 = vperm.xlu0 %6512, %v5872_v25  }
 0xa27   : > { %5261 = vperm.xlu1 %6513, %v5870_v26  }
 0xa28   : > { %5266 = vperm.xlu0 %6512, %v5871_v27  }
 0xa2b   : > { %5348 = vperm.xlu1 %6513, %v5863_v28  }
 0xa2c   : > { %5343 = vperm.xlu0 %6512, %v5862_v0  }
 0xa2f   : > { %5358 = vperm.xlu1 %6513, %v5865_v29  }
 0xa30   : > { %5353 = vperm.xlu0 %6512, %v5864_v30  }
 0xa63   : > { %v4309_v56 = vpop.xlane.xlu1 %4308 }
 0xa64   : > { %6570 = vrcp.f32 %v4309_v56 }
 0xa67   : > { %v4312_v57 = vpop.xlane.xlu0 %4311 }
 0xa68   : > { %6572 = vrcp.f32 %v4312_v57 }
 0xa6b   : > { %v4315_v42 = vpop.xlane.xlu0 %4314 }
 0xa6c   : > { %6574 = vrcp.f32 %v4315_v42 }
 0xa6f   : > { %v4318_v11 = vpop.xlane.xlu1 %4317 }
 0xa70   : > { %6576 = vrcp.f32 %v4318_v11 }
 0xa71   : > { %v6571_v38 = vpop.eup %6570 }
 0xa72   : > { %v4332_v41 = vmul.f32 %v6571_v38, %v7408_v21  ;;  %v5824_v38 = vld [vmem:[%s7762_s3 + $0x210] sm:$0xff] }
 0xa73   : > { %v4321_v43 = vpop.xlane.xlu0 %4320 }
 0xa74   : > { %6578 = vrcp.f32 %v4321_v43  ;;  %6395 = vmatpush3.xpose.msk.msra.mxu1 %vm1121_vm4, %v4332_v41  ;;  %v5825_v41 = vld [vmem:[%s7762_s3 + $0x218] sm:$0xff]  ;;  %v5826_v43 = vld [vmem:[%s7762_s3 + $0x220] sm:$0xff] }
 0xa75   : > { %v6573_v45 = vpop.eup %6572  ;;  %6399 = vmatprep.subr.mxu1 %v6606_v58 }
 0xa76   : > { %v4334_v47 = vmul.f32 %v6573_v45, %v7412_v44  ;;  %v3390_v44 = vpop.f32.mrf.mxu0 }
 0xa77   : > { %6397 = vmatmul.mubr.msk.f32.vlgmr.msra.gmra.mxu1 %vm1121_vm4, %v3381_v46  ;;  %v4324_v49 = vpop.xlane.xlu1 %4323  ;;  %v3391_v4 = vadd.f32 %v3390_v44, %v3135_v32  ;;  %v5820_v32 = vld [vmem:[%s7762_s3 + $0x1f0] sm:$0xff] }
 0xa78   : > { %6580 = vrcp.f32 %v4324_v49  ;;  %6400 = vmatpush3.xpose.msk.msra.mxu1 %vm1121_vm4, %v4334_v47  ;;  %6401 = vmatprep.mubr.msk.f32.mxu1 %vm6607_vm3, %v6606_v58 }
 0xa79   : > { %v6575_v21 = vpop.eup %6574  ;;  %6404 = vmatprep.subr.mxu1 %v6606_v58 }
 0xa7a   : > { %v4336_v55 = vmul.f32 %v6575_v21, %v7416_v50  ;;  %v6350_v50 = vpop.f32.mrf.mxu0 }
 0xa7b   : > { %6402 = vmatmul.mubr.msk.f32.vlgmr.msra.gmra.mxu1 %vm1121_vm4, %v3386_v51  ;;  %v4327_v60 = vpop.xlane.xlu0 %4326  ;;  %v3406_v17 = vadd.f32 %v6350_v50, %v7506_v37  ;;  %v5821_v37 = vld [vmem:[%s7762_s3 + $0x1f8] sm:$0xff] }
 0xa7c   : > { %6582 = vrcp.f32 %v4327_v60  ;;  %6405 = vmatpush3.xpose.msk.msra.mxu1 %vm1121_vm4, %v4336_v55  ;;  %6406 = vmatprep.mubr.msk.f32.mxu1 %vm6607_vm3, %v6606_v58  ;;  %v3400_v1 = vpop.f32.mrf.mxu0 }
 0xa7d   : > { %v6577_v61 = vpop.eup %6576  ;;  %6414 = vmatprep.subr.mxu1 %v6606_v58  ;;  %v3401_v15 = vadd.f32 %v3400_v1, %v3145_v35 }
 0xa7e   : > { %v4338_v39 = vmul.f32 %v6577_v61, %v7420_v40  ;;  %v6353_v63 = vpop.f32.mrf.mxu0 }
 0xa7f   : > { %v4330_v8 = vpop.xlane.xlu1 %4329  ;;  %6407 = vmatmul.mubr.msk.f32.vlgmr.msra.gmra.mxu1 %vm1121_vm4, %v3391_v4 }
 0xa80   : > { %6584 = vrcp.f32 %v4330_v8  ;;  %6410 = vmatpush3.xpose.msk.msra.mxu0 %vm1121_vm4, %v4338_v39  ;;  %6416 = vmatprep.mubr.msk.f32.mxu1 %vm6607_vm3, %v6606_v58  ;;  %v3410_v48 = vpop.f32.mrf.mxu0 }
 0xa81   : > { %v6579_v12 = vpop.eup %6578  ;;  %6419 = vmatprep.subr.mxu0 %v6606_v58 }
 0xa82   : > { %v4340_v14 = vmul.f32 %v6579_v12, %v7424_v36 }
 0xa83   : > { %6412 = vmatmul.mubr.msk.f32.vlgmr.msra.gmra.mxu0 %vm1121_vm4, %v3396_v2  ;;  %v3155_v62 = vpop.permute.xlu1 %3154  ;;  %v3160_v53 = vpop.permute.xlu0 %3159 }
 0xa84   : > { %6415 = vmatpush3.xpose.msk.msra.mxu1 %vm1121_vm4, %v4340_v14  ;;  %6421 = vmatprep.mubr.msk.f32.mxu0 %vm6607_vm3, %v6606_v58  ;;  %v3411_v20 = vadd.f32 %v3410_v48, %v3155_v62  ;;  %v3416_v23 = vadd.f32 %v6353_v63, %v3160_v53 }
 0xa85   : > { %v6581_v40 = vpop.eup %6580  ;;  %6424 = vmatprep.subr.mxu1 %v6606_v58 }
 0xa86   : > { %v4342_v16 = vmul.f32 %v6581_v40, %v7428_v6 }
 0xa87   : > { %6417 = vmatmul.mubr.msk.f32.vlgmr.msra.gmra.mxu1 %vm1121_vm4, %v3401_v15  ;;  %v4958_v7 = vpop.permute.xlu0 %4957  ;;  %v4963_v47 = vpop.permute.xlu1 %4962 }
 0xa88   : > { %6420 = vmatpush3.xpose.msk.msra.mxu0 %vm1121_vm4, %v4342_v16  ;;  %6426 = vmatprep.mubr.msk.f32.mxu1 %vm6607_vm3, %v6606_v58 }
 0xa89   : > { %v6583_v36 = vpop.eup %6582  ;;  %6429 = vmatprep.subr.mxu0 %v6606_v58 }
 0xa8a   : > { %v4344_v19 = vmul.f32 %v6583_v36, %v7432_v10  ;;  %v5818_v10 = vld [vmem:[%s7762_s3 + $0x1e0] sm:$0xff] }
 0xa8b   : > { %6422 = vmatmul.mubr.msk.f32.vlgmr.msra.gmra.mxu0 %vm1121_vm4, %v3406_v17  ;;  %v5075_v45 = vpop.permute.xlu0 %5074  ;;  %v5080_v12 = vpop.permute.xlu1 %5079 }
 0xa8c   : > { %6425 = vmatpush3.xpose.msk.msra.mxu1 %vm1121_vm4, %v4344_v19  ;;  %6431 = vmatprep.mubr.msk.f32.mxu0 %vm6607_vm3, %v6606_v58 }
 0xa8d   : > { %v6585_v6 = vpop.eup %6584 }
 0xa8e   : > { %v4346_v22 = vmul.f32 %v6585_v6, %v7436_v13 }
 0xa8f   : > { %6427 = vmatmul.mubr.msk.f32.vlgmr.msra.gmra.mxu1 %vm1121_vm4, %v3411_v20  ;;  %v4968_v46 = vpop.permute.xlu0 %4967  ;;  %v5085_v36 = vpop.permute.xlu1 %5084 }
 0xa90   : > { %6430 = vmatpush3.xpose.msk.msra.mxu0 %vm1121_vm4, %v4346_v22  ;;  %6442 = vmatprep.mubr.msk.f32.mxu1 %vm607_vm2, %v5818_v10 }
 0xa93   : > { %6432 = vmatmul.mubr.msk.f32.vlgmr.msra.gmra.mxu0 %vm1121_vm4, %v3416_v23  ;;  %v4973_v55 = vpop.permute.xlu0 %4972  ;;  %v5090_v22 = vpop.permute.xlu1 %5089 }
 0xa94   : > { %6456 = vmatprep.mubr.msk.f32.mxu0 %vm607_vm2, %v5822_v24 }
 0xb37   : > { %v4419_v13 = vpop.f32.mrf.mxu1 }
 0xb39   : > { %v6398_v59 = vpop.f32.mrf.mxu1 }
 0xb3b   : > { %v4495_v25 = vpop.f32.mrf.mxu1 }
 0xb3d   : > { %v6403_v26 = vpop.f32.mrf.mxu1 }
 0xb3f   : > { %v4571_v27 = vpop.f32.mrf.mxu1 }
 0xb41   : > { %v6408_v28 = vpop.f32.mrf.mxu1 }
 0xb43   : > { %v4647_v0 = vpop.f32.mrf.mxu0 }
 0xb44   : > { %6434 = vmatprep.subr.mxu1 %v4647_v0 }
 0xb45   : > { %v6413_v29 = vpop.f32.mrf.mxu0  ;;  %6435 = vmatpush3.msra.mxu1 %v4647_v0 }
 0xb46   : > { %6436 = vmatprep.subr.mxu1 %v4571_v27 }
 0xb47   : > { %v4723_v30 = vpop.f32.mrf.mxu1  ;;  %6437 = vmatpush3.msra.mxu1 %v4571_v27 }
 0xb48   : > { %6438 = vmatprep.subr.mxu1 %v4495_v25 }
 0xb49   : > { %v6418_v31 = vpop.f32.mrf.mxu1  ;;  %6439 = vmatpush3.msra.mxu1 %v4495_v25 }
 0xb4a   : > { %6440 = vmatprep.subr.mxu1 %v4419_v13 }
 0xb4b   : > { %v4799_v33 = vpop.f32.mrf.mxu0  ;;  %6441 = vmatpush3.msra.mxu1 %v4419_v13 }
 0xb4c   : > { %6443 = vmatmul.mubr.msk.f32.vlgmr.msra.gmra.mxu1 %vm607_vm2, %v5819_v3 }
 0xb4d   : > { %v6423_v35 = vpop.f32.mrf.mxu0  ;;  %6445 = vmatprep.mubr.msk.f32.mxu1 %vm607_vm2, %v5820_v32 }
 0xb4f   : > { %v4875_v56 = vpop.f32.mrf.mxu1 }
 0xb50   : > { %6446 = vmatmul.mubr.msk.f32.gmra.mxu1 %vm607_vm2, %v5821_v37 }
 0xb51   : > { %v6428_v57 = vpop.f32.mrf.mxu1  ;;  %6470 = vmatprep.mubr.msk.f32.mxu1 %vm607_vm2, %v5826_v43 }
 0xb53   : > { %v4951_v42 = vpop.f32.mrf.mxu0 }
 0xb54   : > { %6448 = vmatprep.subr.mxu0 %v4951_v42 }
 0xb55   : > { %v6433_v11 = vpop.f32.mrf.mxu0  ;;  %6449 = vmatpush3.msra.mxu0 %v4951_v42 }
 0xb56   : > { %6450 = vmatprep.subr.mxu0 %v4875_v56 }
 0xb57   : > { %6451 = vmatpush3.msra.mxu0 %v4875_v56 }
 0xb58   : > { %6452 = vmatprep.subr.mxu0 %v4799_v33 }
 0xb59   : > { %6453 = vmatpush3.msra.mxu0 %v4799_v33 }
 0xb5a   : > { %6454 = vmatprep.subr.mxu0 %v4723_v30 }
 0xb5b   : > { %6455 = vmatpush3.msra.mxu0 %v4723_v30 }
 0xb5c   : > { %6457 = vmatmul.mubr.msk.f32.vlgmr.msra.gmra.mxu0 %vm607_vm2, %v5823_v18  ;;  %6476 = vmatprep.subr.mxu0 %v6606_v58 }
 0xb5d   : > { %6459 = vmatprep.mubr.msk.f32.mxu0 %vm607_vm2, %v5824_v38 }
 0xb60   : > { %6460 = vmatmul.mubr.msk.f32.gmra.mxu0 %vm607_vm2, %v5825_v41 }
 0xb61   : > { %6484 = vmatprep.mubr.msk.f32.mxu0 %vm6607_vm3, %v6606_v58 }
 0xc0c   : > { %v6444_v49 = vpop.f32.mrf.mxu1 }
 0xc0d   : > { %v5059_v9 = vadd.f32 %v6444_v49, %v4963_v47 }
 0xc0e   : > { %v5053_v21 = vpop.f32.mrf.mxu1 }
 0xc0f   : > { %v5054_v51 = vadd.f32 %v5053_v21, %v4958_v7  ;;  %v5190_v44 = vadd.f32 %v5059_v9, %v7245_v54 }
 0xc10   : > { %v6447_v60 = vpop.f32.mrf.mxu1 }
 0xc11   : > { %v5189_v61 = vadd.f32 %v5054_v51, %v7250_v52  ;;  %v5069_v4 = vadd.f32 %v6447_v60, %v4973_v55  ;;  %v5194_v2 = vsel %vm1121_vm4, %v5190_v44, 0.0 }
 0xc12   : > { %v5063_v39 = vpop.f32.mrf.mxu1 }
 0xc13   : > { %v5193_v8 = vsel %vm1121_vm4, %v5189_v61, 0.0  ;;  %v5064_v50 = vadd.f32 %v5063_v39, %v4968_v46  ;;  %v5192_v1 = vadd.f32 %v5069_v4, %v7234_v34 }
 0xc14   : > { %v5195_v40 = vadd.f32 %v5194_v2, %v5193_v8 }
 0xc15   : > { %v5191_v14 = vadd.f32 %v5064_v50, %v7239_v5  ;;  %v5198_v16 = vsel %vm1121_vm4, %v5192_v1, 0.0 }
 0xc17   : > { %v5196_v15 = vsel %vm1121_vm4, %v5191_v14, 0.0 }
 0xc18   : > { %v5197_v63 = vadd.f32 %v5196_v15, %v5195_v40 }
 0xc1a   : > { %v5199_v17 = vadd.f32 %v5198_v16, %v5197_v63 }
 0xc1c   : > { %v5200_v48 = vrot.slane %v5199_v17, 4  ;;  %v6458_v62 = vpop.f32.mrf.mxu0 }
 0xc1d   : > { %v5176_v19 = vadd.f32 %v6458_v62, %v5080_v12 }
 0xc1e   : > { %v5201_v6 = vadd.f32 %v5200_v48, %v5199_v17  ;;  %v5170_v20 = vpop.f32.mrf.mxu0 }
 0xc1f   : > { %v5171_v53 = vadd.f32 %v5170_v20, %v5075_v45  ;;  %v5284_v24 = vadd.f32 %v5176_v19, %v7245_v54 }
 0xc20   : > { %v5202_v23 = vrot.slane %v5201_v6, 2  ;;  %v6461_v10 = vpop.f32.mrf.mxu0 }
 0xc21   : > { %v5283_v13 = vadd.f32 %v5171_v53, %v7250_v52  ;;  %v5186_v59 = vadd.f32 %v6461_v10, %v5090_v22  ;;  %v5288_v29 = vsel %vm1121_vm4, %v5284_v24, 0.0 }
 0xc22   : > { %v5203_v25 = vadd.f32 %v5202_v23, %v5201_v6  ;;  %v5180_v26 = vpop.f32.mrf.mxu0 }
 0xc23   : > { %v5287_v27 = vsel %vm1121_vm4, %v5283_v13, 0.0  ;;  %v5181_v28 = vadd.f32 %v5180_v26, %v5085_v36  ;;  %v5286_v30 = vadd.f32 %v5186_v59, %v7234_v34 }
 0xc24   : > { %v5204_v0 = vrot.slane %v5203_v25, 1  ;;  %v5289_v32 = vadd.f32 %v5288_v29, %v5287_v27  ;;  %v7622_v29 = vpop.permute.xlu0 %5252 }
 0xc25   : > { %v5285_v31 = vadd.f32 %v5181_v28, %v7239_v5  ;;  %v5292_v52 = vsel %vm1121_vm4, %v5286_v30, 0.0 }
 0xc26   : > { %v5205_v3 = vadd.f32 %v5204_v0, %v5203_v25 }
 0xc27   : > { %v5290_v33 = vsel %vm1121_vm4, %v5285_v31, 0.0 }
 0xc28   : > { %v5206_v54 = vmul.f32 0.03125, %v5205_v3  ;;  %v5291_v35 = vadd.f32 %v5290_v33, %v5289_v32  ;;  %v7626_v3 = vpop.permute.xlu0 %5276 }
 0xc2a   : > { %v7606_v37 = vsub.f32 %v5189_v61, %v5206_v54  ;;  %v7608_v56 = vsub.f32 %v5190_v44, %v5206_v54  ;;  %v5209_v57 = vsub.f32 %v5191_v14, %v5206_v54  ;;  %v5210_v42 = vsub.f32 %v5192_v1, %v5206_v54 }
 0xc2b   : > { %v5293_v11 = vadd.f32 %v5292_v52, %v5291_v35 }
 0xc2c   : > { %v5211_v34 = vmul.f32 %v7606_v37, %v7606_v37  ;;  %v5212_v5 = vmul.f32 %v7608_v56, %v7608_v56  ;;  %v5213_v18 = vmul.f32 %v5209_v57, %v5209_v57  ;;  %v5214_v41 = vmul.f32 %v5210_v42, %v5210_v42  ;;  %v7630_v52 = vpop.permute.xlu0 %5271 }
 0xc2d   : > { %v5294_v38 = vrot.slane %v5293_v11, 4 }
 0xc2e   : > { %v5215_v43 = vsel %vm1121_vm4, %v5211_v34, 0.0  ;;  %v5216_v7 = vsel %vm1121_vm4, %v5212_v5, 0.0  ;;  %v5218_v47 = vsel %vm1121_vm4, %v5213_v18, 0.0  ;;  %v5220_v21 = vsel %vm1121_vm4, %v5214_v41, 0.0 }
 0xc2f   : > { %v5217_v45 = vadd.f32 %v5216_v7, %v5215_v43  ;;  %v5295_v46 = vadd.f32 %v5294_v38, %v5293_v11 }
 0xc31   : > { %v5219_v49 = vadd.f32 %v5218_v47, %v5217_v45  ;;  %v5296_v9 = vrot.slane %v5295_v46, 2 }
 0xc33   : > { %v5221_v51 = vadd.f32 %v5220_v21, %v5219_v49  ;;  %v5297_v55 = vadd.f32 %v5296_v9, %v5295_v46 }
 0xc35   : > { %v5222_v60 = vrot.slane %v5221_v51, 4  ;;  %v5298_v44 = vrot.slane %v5297_v55, 1 }
 0xc37   : > { %v5223_v61 = vadd.f32 %v5222_v60, %v5221_v51  ;;  %v5299_v4 = vadd.f32 %v5298_v44, %v5297_v55  ;;  %v7646_v51 = vpop.permute.xlu0 %5266 }
 0xc39   : > { %v5224_v39 = vrot.slane %v5223_v61, 2  ;;  %v5300_v8 = vmul.f32 0.03125, %v5299_v4 }
 0xc3b   : > { %v5225_v50 = vadd.f32 %v5224_v39, %v5223_v61  ;;  %v5301_v12 = vsub.f32 %v5283_v13, %v5300_v8  ;;  %v5302_v2 = vsub.f32 %v5284_v24, %v5300_v8  ;;  %v5303_v1 = vsub.f32 %v5285_v31, %v5300_v8 }
 0xc3c   : > { %v5304_v14 = vsub.f32 %v5286_v30, %v5300_v8  ;;  %v7624_v30 = vpop.permute.xlu1 %5247 }
 0xc3d   : > { %v5305_v40 = vmul.f32 %v5301_v12, %v5301_v12  ;;  %v5306_v15 = vmul.f32 %v5302_v2, %v5302_v2  ;;  %v5307_v63 = vmul.f32 %v5303_v1, %v5303_v1  ;;  %v5226_v16 = vrot.slane %v5225_v50, 1 }
 0xc3e   : > { %v5308_v36 = vmul.f32 %v5304_v14, %v5304_v14 }
 0xc3f   : > { %v5309_v17 = vsel %vm1121_vm4, %v5305_v40, 0.0  ;;  %v5310_v48 = vsel %vm1121_vm4, %v5306_v15, 0.0  ;;  %v5312_v19 = vsel %vm1121_vm4, %v5307_v63, 0.0  ;;  %v5227_v20 = vadd.f32 %v5226_v16, %v5225_v50  ;;  %v5829_v40 = vld [vmem:[%s7762_s3 + $0x238] sm:$0xff]  ;;  %v7671_v15 = vld [vmem:[%s7764_s5] sm:$0xff]  ;;  %v7676_v63 = vld [vmem:[%s7764_s5 + $0x8] sm:$0xff] }
 0xc40   : > { %v5311_v62 = vadd.f32 %v5310_v48, %v5309_v17  ;;  %v5314_v53 = vsel %vm1121_vm4, %v5308_v36, 0.0  ;;  %v7628_v32 = vpop.permute.xlu1 %5242  ;;  %v6608_v16 = vmov 32   ;;  %v7683_v36 = vld [vmem:[%s7764_s5 + $0x10] sm:$0xff]  ;;  %v7688_v17 = vld [vmem:[%s7764_s5 + $0x18] sm:$0xff]  ;;  %v7695_v48 = vld [vmem:[%s7764_s5 + $0x20] sm:$0xf] }
 0xc41   : > { %v5228_v10 = vmul.f32 0.03125, %v5227_v20  ;;  %6515 = vset.pattern.permute.xlu1 %v6608_v16  ;;  %6514 = vset.pattern.permute.xlu0 %v6608_v16 }
 0xc42   : > { %v5313_v6 = vadd.f32 %v5312_v19, %v5311_v62  ;;  %5524 = vperm.xlu1 %6515, %v7676_v63   ;;  %5519 = vperm.xlu0 %6514, %v7671_v15   ;;  %v5344_v19 = vpop.permute.xlu0 %5343 }
 0xc43   : > { %v5229_v59 = vadd.f32 1e-05, %v5228_v10 }
 0xc44   : > { %v5315_v22 = vadd.f32 %v5314_v53, %v5313_v6  ;;  %v7634_v43 = vpop.permute.xlu1 %5237 }
 0xc45   : > { %6586 = vrsqrt.f32 %v5229_v59 }
 0xc46   : > { %v5316_v23 = vrot.slane %v5315_v22, 4  ;;  %5529 = vperm.xlu1 %6515, %v7683_v36   ;;  %5534 = vperm.xlu0 %6514, %v7688_v17  }
 0xc48   : > { %v5317_v24 = vadd.f32 %v5316_v23, %v5315_v22  ;;  %v7651_v61 = vpop.permute.xlu1 %5261 }
 0xc4a   : > { %v5318_v13 = vrot.slane %v5317_v24, 2  ;;  %5539 = vperm.xlu1 %6515, %v7695_v48  }
 0xc4c   : > { %v5319_v25 = vadd.f32 %v5318_v13, %v5317_v24  ;;  %v5349_v62 = vpop.permute.xlu1 %5348 }
 0xc4e   : > { %v5320_v26 = vrot.slane %v5319_v25, 1 }
 0xc50   : > { %v5321_v27 = vadd.f32 %v5320_v26, %v5319_v25  ;;  %v5359_v23 = vpop.permute.xlu1 %5358  ;;  %v5354_v25 = vpop.permute.xlu0 %5353 }
 0xc52   : > { %v5322_v28 = vmul.f32 0.03125, %v5321_v27  ;;  %v6587_v31 = vpop.eup %6586 }
 0xc53   : > { %v5234_v33 = vmul.f32 %v6587_v31, %v5210_v42  ;;  %v5233_v54 = vmul.f32 %v6587_v31, %v5209_v57  ;;  %v5232_v34 = vmul.f32 %v6587_v31, %v7608_v56  ;;  %v5231_v7 = vmul.f32 %v6587_v31, %v7606_v37 }
 0xc54   : > { %v5323_v0 = vadd.f32 1e-05, %v5322_v28 }
 0xc55   : > { %v5258_v11 = vmul.f32 %v7622_v29, %v5234_v33  ;;  %v5257_v42 = vmul.f32 %v7624_v30, %v5233_v54  ;;  %v5256_v47 = vmul.f32 %v7628_v32, %v5232_v34  ;;  %v5255_v44 = vmul.f32 %v7634_v43, %v5231_v7 }
 0xc56   : > { %6588 = vrsqrt.f32 %v5323_v0 }
 0xc57   : > { %v5282_v56 = vadd.f32 %v7626_v3, %v5258_v11  ;;  %v5281_v55 = vadd.f32 %v7630_v52, %v5257_v42  ;;  %v5280_v39 = vadd.f32 %v7646_v51, %v5256_v47 }
 0xc63   : > { %v6589_v35 = vpop.eup %6588 }
 0xc64   : > { %v5327_v5 = vmul.f32 %v6589_v35, %v5303_v1  ;;  %v5328_v18 = vmul.f32 %v6589_v35, %v5304_v14  ;;  %v5326_v38 = vmul.f32 %v6589_v35, %v5302_v2  ;;  %v5325_v41 = vmul.f32 %v6589_v35, %v5301_v12  ;;  %v5827_v1 = vld [vmem:[%s7762_s3 + $0x228] sm:$0xff]  ;;  %v5828_v14 = vld [vmem:[%s7762_s3 + $0x230] sm:$0xff] }
 0xc65   : > { %v5279_v12 = vadd.f32 %v7651_v61, %v5255_v44 }
 0xc66   : > { %v5332_v45 = vmul.f32 %v5328_v18, %v7622_v29  ;;  %v5331_v57 = vmul.f32 %v5327_v5, %v7624_v30  ;;  %v5330_v46 = vmul.f32 %v5326_v38, %v7628_v32  ;;  %v5329_v21 = vmul.f32 %v5325_v41, %v7634_v43 }
 0xc68   : > { %v5336_v49 = vadd.f32 %v5332_v45, %v7626_v3  ;;  %v5335_v9 = vadd.f32 %v5331_v57, %v7630_v52  ;;  %v5334_v60 = vadd.f32 %v5330_v46, %v7646_v51  ;;  %v5333_v8 = vadd.f32 %v5329_v21, %v7651_v61 }
 0xc6a   : > { %v5340_v37 = vadd.f32 %v5336_v49, %v5282_v56  ;;  %v5339_v4 = vadd.f32 %v5335_v9, %v5281_v55  ;;  %v5338_v50 = vadd.f32 %v5334_v60, %v5280_v39  ;;  %v5337_v2 = vadd.f32 %v5333_v8, %v5279_v12 }
 0xc6c   : > { %6462 = vmatprep.subr.mxu1 %v5340_v37 }
 0xc6d   : > { %6463 = vmatpush3.msra.mxu1 %v5340_v37 }
 0xc6e   : > { %6464 = vmatprep.subr.mxu1 %v5339_v4 }
 0xc6f   : > { %6465 = vmatpush3.msra.mxu1 %v5339_v4 }
 0xc70   : > { %6466 = vmatprep.subr.mxu1 %v5338_v50 }
 0xc71   : > { %6467 = vmatpush3.msra.mxu1 %v5338_v50 }
 0xc72   : > { %6468 = vmatprep.subr.mxu1 %v5337_v2 }
 0xc73   : > { %6469 = vmatpush3.msra.mxu1 %v5337_v2 }
 0xc74   : > { %6471 = vmatmul.mubr.msk.f32.vlgmr.msra.gmra.mxu1 %vm607_vm2, %v5827_v1 }
 0xc75   : > { %6473 = vmatprep.mubr.msk.f32.mxu1 %vm607_vm2, %v5828_v14 }
 0xc78   : > { %6474 = vmatmul.mubr.msk.f32.gmra.mxu1 %vm607_vm2, %v5829_v40 }
 0xd34   : > { %v6472_v6 = vpop.f32.mrf.mxu1 }
 0xd35   : > { %v5445_v20 = vadd.f32 %v6472_v6, %v5349_v62 }
 0xd36   : > { %v5439_v53 = vpop.f32.mrf.mxu1 }
 0xd37   : > { %v5440_v22 = vadd.f32 %v5439_v53, %v5344_v19  ;;  %v5459_v24 = vadd.f32 %v5445_v20, %v5338_v50 }
 0xd38   : > { %v6475_v10 = vpop.f32.mrf.mxu1 }
 0xd39   : > { %v5458_v13 = vadd.f32 %v5440_v22, %v5337_v2  ;;  %v5455_v59 = vadd.f32 %v6475_v10, %v5359_v23  ;;  %v5463_v0 = vsel %vm1121_vm4, %v5459_v24, 0.0 }
 0xd3a   : > { %v5449_v26 = vpop.f32.mrf.mxu1 }
 0xd3b   : > { %v5462_v27 = vsel %vm1121_vm4, %v5458_v13, 0.0  ;;  %v5450_v28 = vadd.f32 %v5449_v26, %v5354_v25  ;;  %v5461_v31 = vadd.f32 %v5455_v59, %v5340_v37 }
 0xd3c   : > { %v5464_v54 = vadd.f32 %v5463_v0, %v5462_v27 }
 0xd3d   : > { %v5460_v33 = vadd.f32 %v5450_v28, %v5339_v4  ;;  %v5467_v34 = vsel %vm1121_vm4, %v5461_v31, 0.0 }
 0xd3f   : > { %v5465_v35 = vsel %vm1121_vm4, %v5460_v33, 0.0 }
 0xd40   : > { %v5466_v11 = vadd.f32 %v5465_v35, %v5464_v54  ;;  %v6594_v35 = vld [vmem:[%s6668_s8 + $0x10] sm:$0xff] }
 0xd42   : > { %v5468_v5 = vadd.f32 %v5467_v34, %v5466_v11 }
 0xd44   : > { %v5469_v18 = vrot.slane %v5468_v5, 4 }
 0xd46   : > { %v5470_v38 = vadd.f32 %v5469_v18, %v5468_v5 }
 0xd48   : > { %v5471_v41 = vrot.slane %v5470_v38, 2 }
 0xd4a   : > { %v5472_v7 = vadd.f32 %v5471_v41, %v5470_v38  ;;  %v6595_v38 = vld [vmem:[%s6668_s8 + $0x18] sm:$0xff] }
 0xd4c   : > { %v5473_v45 = vrot.slane %v5472_v7, 1 }
 0xd4e   : > { %v5474_v42 = vadd.f32 %v5473_v45, %v5472_v7 }
 0xd50   : > { %v5475_v57 = vmul.f32 0.03125, %v5474_v42 }
 0xd52   : > { %v5476_v46 = vsub.f32 %v5458_v13, %v5475_v57  ;;  %v5477_v47 = vsub.f32 %v5459_v24, %v5475_v57  ;;  %v5478_v56 = vsub.f32 %v5460_v33, %v5475_v57  ;;  %v5479_v49 = vsub.f32 %v5461_v31, %v5475_v57 }
 0xd54   : > { %v5480_v9 = vmul.f32 %v5476_v46, %v5476_v46  ;;  %v5481_v21 = vmul.f32 %v5477_v47, %v5477_v47  ;;  %v5482_v37 = vmul.f32 %v5478_v56, %v5478_v56  ;;  %v5483_v55 = vmul.f32 %v5479_v49, %v5479_v49 }
 0xd56   : > { %v5484_v60 = vsel %vm1121_vm4, %v5480_v9, 0.0  ;;  %v5485_v44 = vsel %vm1121_vm4, %v5481_v21, 0.0  ;;  %v5487_v39 = vsel %vm1121_vm4, %v5482_v37, 0.0  ;;  %v5489_v50 = vsel %vm1121_vm4, %v5483_v55, 0.0 }
 0xd57   : > { %v5486_v4 = vadd.f32 %v5485_v44, %v5484_v60 }
 0xd59   : > { %v5488_v8 = vadd.f32 %v5487_v39, %v5486_v4 }
 0xd5b   : > { %v5490_v12 = vadd.f32 %v5489_v50, %v5488_v8 }
 0xd5d   : > { %v5491_v2 = vrot.slane %v5490_v12, 4 }
 0xd5f   : > { %v5492_v1 = vadd.f32 %v5491_v2, %v5490_v12 }
 0xd61   : > { %v5493_v14 = vrot.slane %v5492_v1, 2 }
 0xd63   : > { %v5494_v40 = vadd.f32 %v5493_v14, %v5492_v1 }
 0xd65   : > { %v5495_v16 = vrot.slane %v5494_v40, 1 }
 0xd67   : > { %v5496_v62 = vadd.f32 %v5495_v16, %v5494_v40 }
 0xd69   : > { %v5497_v19 = vmul.f32 0.03125, %v5496_v62 }
 0xd6b   : > { %v5498_v6 = vadd.f32 1e-05, %v5497_v19 }
 0xd6d   : > { %6590 = vrsqrt.f32 %v5498_v6 }
 0xd7a   : > { %v6591_v20 = vpop.eup %6590 }
 0xd7b   : > { %v5502_v53 = vmul.f32 %v6591_v20, %v5478_v56  ;;  %v5503_v22 = vmul.f32 %v6591_v20, %v5479_v49  ;;  %v5501_v23 = vmul.f32 %v6591_v20, %v5477_v47  ;;  %v5500_v13 = vmul.f32 %v6591_v20, %v5476_v46  ;;  %v6596_v46 = vld [vmem:[%s6668_s8 + $0x20] sm:$0xf] }
 0xd7d   : > { %v5506_v10 = vmul.f32 %v5502_v53, %v7624_v30  ;;  %v5507_v24 = vmul.f32 %v5503_v22, %v7622_v29  ;;  %v5505_v25 = vmul.f32 %v5501_v23, %v7628_v32  ;;  %v5504_v27 = vmul.f32 %v5500_v13, %v7634_v43  ;;  %v5520_v30 = vpop.permute.xlu0 %5519  ;;  %v5525_v43 = vpop.permute.xlu1 %5524 }
 0xd7f   : > { %v5511_v59 = vadd.f32 %v5507_v24, %v7626_v3  ;;  %v5510_v26 = vadd.f32 %v5506_v10, %v7630_v52  ;;  %v5509_v28 = vadd.f32 %v5505_v25, %v7646_v51  ;;  %v5508_v29 = vadd.f32 %v5504_v27, %v7651_v61  ;;  %v6592_v51 = vld [vmem:[%s6668_s8] sm:$0xff] }
 0xd81   : > { %6477 = vmatpush3.msra.mxu0 %v5511_v59  ;;  %v5530_v0 = vpop.permute.xlu1 %5529  ;;  %v5535_v54 = vpop.permute.xlu0 %5534 }
 0xd82   : > { %6478 = vmatprep.subr.mxu0 %v6606_v58 }
 0xd83   : > { %6479 = vmatpush3.msra.mxu0 %v5510_v26 }
 0xd84   : > { %6480 = vmatprep.subr.mxu0 %v6606_v58 }
 0xd85   : > { %6481 = vmatpush3.msra.mxu0 %v5509_v28  ;;  %v5540_v7 = vpop.permute.xlu1 %5539 }
 0xd86   : > { %6482 = vmatprep.subr.mxu0 %v6606_v58 }
 0xd87   : > { %6483 = vmatpush3.msra.mxu0 %v5508_v29 }
 0xd88   : > { %6485 = vmatmul.mubr.msk.f32.vlgmr.msra.gmra.mxu0 %vm607_vm2, %v7671_v15 }
 0xd89   : > { %6487 = vmatprep.mubr.msk.f32.mxu0 %vm6607_vm3, %v6606_v58 }
 0xd8c   : > { %6488 = vmatmul.mubr.msk.f32.gmra.mxu0 %vm607_vm2, %v7676_v63 }
 0xd8d   : > { %6490 = vmatprep.mubr.msk.f32.mxu0 %vm6607_vm3, %v6606_v58 }
 0xd90   : > { %6491 = vmatmul.mubr.msk.f32.gmra.mxu0 %vm607_vm2, %v7683_v36  ;;  %v6593_v36 = vld [vmem:[%s6668_s8 + $0x8] sm:$0xff] }
 0xd91   : > { %6493 = vmatprep.mubr.msk.f32.mxu0 %vm6607_vm3, %v6606_v58 }
 0xd94   : > { %6494 = vmatmul.mubr.msk.f32.gmra.mxu0 %vm607_vm2, %v7688_v17 }
 0xd95   : > { %6496 = vmatprep.mubr.msk.f32.mxu0 %vm6607_vm3, %v6606_v58 }
 0xd98   : > { %6497 = vmatmul.mubr.msk.f32.gmra.mxu0 %vm607_vm2, %v7695_v48 }
 0xe48   : > { %v5618_v3 = vpop.f32.mrf.mxu0 }
 0xe49   : > { %v5619_v32 = vadd.f32 %v5618_v3, %v5520_v30 }
 0xe4a   : > { %v6486_v52 = vpop.f32.mrf.mxu0 }
 0xe4b   : > { %v5642_v61 = vadd.f32 %v6592_v51, %v5619_v32 }
 0xe4c   : > { %v5623_v58 = vpop.f32.mrf.mxu0 }
 0xe4d   : > { %v5624_v15 = vadd.f32 %v5623_v58, %v5525_v43  ;;  %5647 = vst.msk [vmem:[%s7740_s30] sm:$0xff] %vm1121_vm4, %v5642_v61 }
 0xe4e   : > { %v6489_v63 = vpop.f32.mrf.mxu0 }
 0xe4f   : > { %v5643_v17 = vadd.f32 %v6593_v36, %v5624_v15 }
 0xe50   : > { %v5628_v48 = vpop.f32.mrf.mxu0 }
 0xe51   : > { %5648 = vst.msk [vmem:[%s7740_s30 + $0x8] sm:$0xff] %vm1121_vm4, %v5643_v17  ;;  %v5629_v31 = vadd.f32 %v5628_v48, %v5530_v0 }
 0xe52   : > { %v6492_v33 = vpop.f32.mrf.mxu0 }
 0xe53   : > { %v5644_v11 = vadd.f32 %v6594_v35, %v5629_v31 }
 0xe54   : > { %v5633_v34 = vpop.f32.mrf.mxu0 }
 0xe55   : > { %5649 = vst.msk [vmem:[%s7740_s30 + $0x10] sm:$0xff] %vm1121_vm4, %v5644_v11  ;;  %v5634_v5 = vadd.f32 %v5633_v34, %v5535_v54 }
 0xe56   : > { %v6495_v18 = vpop.f32.mrf.mxu0 }
 0xe57   : > { %v5645_v41 = vadd.f32 %v6595_v38, %v5634_v5 }
 0xe58   : > { %v5638_v45 = vpop.f32.mrf.mxu0 }
 0xe59   : > { %v5639_v42 = vadd.f32 %v5638_v45, %v5540_v7  ;;  %5650 = vst.msk [vmem:[%s7740_s30 + $0x18] sm:$0xff] %vm1121_vm4, %v5645_v41 }
 0xe5a   : > { %v6498_v57 = vpop.f32.mrf.mxu0 }
 0xe5b   : > { %v5646_v47 = vadd.f32 %v6596_v46, %v5639_v42 }
 0xe5d   : > { %5652 = vst.msk [vmem:[%s7740_s30 + $0x20] sm:$0xf] %vm5651_vm5, %v5646_v47 }
 0xe5e PF: > { %s16_s21 = sadd.s32 1, %s6603_s21  }
 0xe5f   : > { %p13_p4 = scmp.ge.s32.totalorder %s16_s21, 4  }
 0xe61   :  { %15 = sbr.rel (!%p13_p4) target bundleno = 1 (0x1), region = 79 }

</bundles_post_ra>
